<compile_context>
chip_gen: v6e
topology: v6e:2x2x1
jax: 0.10.0
libtpu: 0.0.40
codegen_flags: <defaults>
</compile_context>

<pallas_src>
import functools
import math

import jax
import jax.numpy as jnp
from jax.experimental import pallas as pl
from jax.experimental.pallas import tpu as pltpu


# ------------------------------ in-kernel math ------------------------------ #

def _ln(x, g, b, eps):
    x = x.astype(jnp.float32)
    mu = jnp.mean(x, axis=-1, keepdims=True)
    var = jnp.mean((x - mu) ** 2, axis=-1, keepdims=True)
    return (x - mu) * jax.lax.rsqrt(var + eps) * g + b


def _gelu(x):
    # TODO(synk): HuggingFace BERT's default is the exact erf GELU; the tanh
    # approximation is used here for a guaranteed EUP lowering path.
    c = 0.7978845608028654
    return 0.5 * x * (1.0 + jnp.tanh(c * (x + 0.044715 * x * x * x)))


# ------------------------------ fused kernel -------------------------------- #

def _encoder_kernel(x_ref, bias_ref, embg_ref, embb_ref,
                    wqkv_ref, bqkv_ref, wo_ref, bo_ref, ln1g_ref, ln1b_ref,
                    w1_ref, b1_ref, w2_ref, b2_ref, ln2g_ref, ln2b_ref,
                    pw_ref, pb_ref, plg_ref, plb_ref,
                    o_ref,
                    h_scr,
                    *, Bb, S, H, nh, eps):
    """Grid = (batch_blocks, layers).  One batch block, one layer per step."""
    l = pl.program_id(1)
    dh = H // nh
    R = Bb * S

    # ---- first layer step of this batch block: embedding LayerNorm into the
    #      resident VMEM activation scratch ----
    @pl.when(l == 0)
    def _():
        h_scr[...] = _ln(x_ref[0], embg_ref[...], embb_ref[...], eps)

    x = h_scr[...]                                             # [R, H] f32

    # ---- fused Q/K/V projection: one MXU pass, N = 3H.  The 1/sqrt(dh) scale
    #      is already folded into the Q columns of wqkv/bqkv (init-time). ----
    qkv = jnp.dot(x.astype(jnp.bfloat16), wqkv_ref[0],
                  preferred_element_type=jnp.float32) + bqkv_ref[0]   # [R, 3H]

    # ---- per-sequence multi-head attention (no dense [B*S, B*S] scores).
    #      q/k/v are [Bb, S, H]; each head is a lane column slice and runs as a
    #      3-D einsum batched over the Bb sequences of this block. ----
    q3 = qkv[:, :H].reshape(Bb, S, H)
    k3 = qkv[:, H:2 * H].reshape(Bb, S, H)
    v3 = qkv[:, 2 * H:].reshape(Bb, S, H)

    # key-padding bias (0 / -1e9), layer-invariant, DMA'd once per batch block;
    # broadcast hoisted out of the head loop.
    key_bias = bias_ref[0]                                     # [Bb, S] f32
    bias3 = jnp.broadcast_to(key_bias[:, None, :], (Bb, S, S)) # [Bb, S, S]

    heads = []
    for h in range(nh):
        cs = slice(h * dh, (h + 1) * dh)
        qh = q3[:, :, cs].astype(jnp.bfloat16)                 # [Bb, S, dh]
        kh = k3[:, :, cs].astype(jnp.bfloat16)
        vh = v3[:, :, cs].astype(jnp.bfloat16)
        s = jnp.einsum("bqd,bkd->bqk", qh, kh,
                       preferred_element_type=jnp.float32)     # [Bb, S, S]
        s = s + bias3
        s = s - jnp.max(s, axis=-1, keepdims=True)
        p = jnp.exp(s)
        p = p * pl.reciprocal(jnp.sum(p, axis=-1, keepdims=True), approx=True)
        heads.append(jnp.einsum("bqk,bkd->bqd", p.astype(jnp.bfloat16), vh,
                                preferred_element_type=jnp.float32))
    # lane-dense register merge of heads: no scratch, no partial column stores.
    attn = jnp.concatenate(heads, axis=-1).reshape(R, H)       # [R, H] f32

    # ---- output projection + residual + LN1 ----
    attn_out = jnp.dot(attn.astype(jnp.bfloat16), wo_ref[0],
                       preferred_element_type=jnp.float32) + bo_ref[0]
    x1 = _ln(x + attn_out, ln1g_ref[0], ln1b_ref[0], eps)

    # ---- FFN (GELU) + residual + LN2 ----
    hmid = jnp.dot(x1.astype(jnp.bfloat16), w1_ref[0],
                   preferred_element_type=jnp.float32) + b1_ref[0]
    hmid = _gelu(hmid)
    ffn = jnp.dot(hmid.astype(jnp.bfloat16), w2_ref[0],
                  preferred_element_type=jnp.float32) + b2_ref[0]
    x2 = _ln(x1 + ffn, ln2g_ref[0], ln2b_ref[0], eps)
    h_scr[...] = x2                                            # carry to next layer

    # ---- last layer step: CLS rows via reshape + row-0 slice (no one-hot
    #      matmul), projection Linear + LayerNorm head ----
    @pl.when(l == pl.num_programs(1) - 1)
    def _():
        cls = x2.reshape(Bb, S, H)[:, 0, :]                    # [Bb, H]
        proj = jnp.dot(cls.astype(jnp.bfloat16), pw_ref[...],
                       preferred_element_type=jnp.float32) + pb_ref[...]
        o_ref[0] = _ln(proj, plg_ref[...], plb_ref[...], eps)


# ------------------------------ pallas_call glue ----------------------------- #

def _shared(shape):
    """Same full block for every (batch-block, layer) grid step."""
    n = len(shape)
    return pl.BlockSpec(shape, lambda b, l, n=n: (0,) * n)


def _per_layer(shape):
    """Stacked [L, ...] array: one layer slice per layer step (auto-pipelined)."""
    n = len(shape)
    return pl.BlockSpec((1,) + shape, lambda b, l, n=n: (l,) + (0,) * n)


def _per_block(shape):
    """Stacked [nb, ...] array: one slice per batch block, layer-invariant."""
    n = len(shape)
    return pl.BlockSpec((1,) + shape, lambda b, l, n=n: (b,) + (0,) * n)


def pallas_encoder(params, x_emb, key_bias, cfg):
    B, S = cfg["batch"], cfg["seq"]
    H, nh, L, I = cfg["hidden"], cfg["heads"], cfg["layers"], cfg["intermediate"]
    nb = cfg["nb"]
    Bb = B // nb

    kernel = functools.partial(_encoder_kernel, Bb=Bb, S=S, H=H, nh=nh, eps=1e-12)

    in_specs = [
        _per_block((Bb * S, H)),                  # embedded input rows
        _per_block((Bb, S)),                      # key-padding bias (layer-invariant)
        _shared((1, H)), _shared((1, H)),         # embedding LN gamma / beta
        _per_layer((H, 3 * H)), _per_layer((1, 3 * H)),   # fused QKV (Q pre-scaled)
        _per_layer((H, H)), _per_layer((1, H)),           # attn output proj
        _per_layer((1, H)), _per_layer((1, H)),           # LN1
        _per_layer((H, I)), _per_layer((1, I)),           # FFN in
        _per_layer((I, H)), _per_layer((1, H)),           # FFN out
        _per_layer((1, H)), _per_layer((1, H)),           # LN2
        _shared((H, H)), _shared((1, H)),                 # project Linear
        _shared((1, H)), _shared((1, H)),                 # project LN
    ]

    # NOTE: at real sizes set pltpu.CompilerParams(vmem_limit_bytes=...) and tile
    # the FFN / QKV matmuls with 256-aligned (tm, tn, tk) blocks for v6e/v7x.
    return pl.pallas_call(
        kernel,
        grid=(nb, L),
        in_specs=in_specs,
        out_specs=pl.BlockSpec((1, Bb, H), lambda b, l: (b, 0, 0)),
        out_shape=jax.ShapeDtypeStruct((nb, Bb, H), jnp.float32),
        scratch_shapes=[pltpu.VMEM((Bb * S, H), jnp.float32)],  # resident activations
        compiler_params=pltpu.CompilerParams(
            dimension_semantics=("parallel", "arbitrary")),     # blocks ∥, layers seq.
    )(
        x_emb, key_bias,
        params["emb_ln_g"], params["emb_ln_b"],
        params["wqkv"], params["bqkv"],
        params["wo"], params["bo"],
        params["ln1_g"], params["ln1_b"],
        params["w1"], params["b1"],
        params["w2"], params["b2"],
        params["ln2_g"], params["ln2_b"],
        params["proj_w"], params["proj_b"],
        params["proj_ln_g"], params["proj_ln_b"],
    )


# ------------------------------ params / forward ----------------------------- #

CFG = dict(vocab=50, max_pos=16, hidden=32, heads=4, layers=2,
           intermediate=64, batch=4, seq=8, nb=2)


def init_params(key, cfg):
    H, I, L, nh = cfg["hidden"], cfg["intermediate"], cfg["layers"], cfg["heads"]
    kcount = [0]

    def nk():
        kcount[0] += 1
        return jax.random.fold_in(key, kcount[0])

    def normal(shape, std=0.02):
        return std * jax.random.normal(nk(), shape, dtype=jnp.float32)

    # TODO(synk): AutoModel.from_pretrained checkpoint loading has no in-script
    # equivalent; weights are randomly initialised with identical forward math.
    scale = 1.0 / math.sqrt(H // nh)
    wq = normal((L, H, H)) * scale            # fold 1/sqrt(dh) into Q weights once
    wk = normal((L, H, H))
    wv = normal((L, H, H))
    wqkv = jnp.concatenate([wq, wk, wv], axis=-1).astype(jnp.bfloat16)
    # Q bias is zero here; if it were nonzero it would be scaled the same way.
    bqkv = jnp.zeros((L, 1, 3 * H), jnp.float32)

    params = {
        "word_emb": normal((cfg["vocab"], H)),
        "pos_emb": normal((cfg["max_pos"], H)),
        "emb_ln_g": jnp.ones((1, H), jnp.float32),
        "emb_ln_b": jnp.zeros((1, H), jnp.float32),
        # per-layer weights stacked along a leading L axis; matmul weights bf16
        "wqkv": wqkv,
        "bqkv": bqkv,
        "wo": normal((L, H, H)).astype(jnp.bfloat16),
        "bo": jnp.zeros((L, 1, H), jnp.float32),
        "ln1_g": jnp.ones((L, 1, H), jnp.float32),
        "ln1_b": jnp.zeros((L, 1, H), jnp.float32),
        "w1": normal((L, H, I)).astype(jnp.bfloat16),
        "b1": jnp.zeros((L, 1, I), jnp.float32),
        "w2": normal((L, I, H)).astype(jnp.bfloat16),
        "b2": jnp.zeros((L, 1, H), jnp.float32),
        "ln2_g": jnp.ones((L, 1, H), jnp.float32),
        "ln2_b": jnp.zeros((L, 1, H), jnp.float32),
        "proj_w": normal((H, H)).astype(jnp.bfloat16),
        "proj_b": jnp.zeros((1, H), jnp.float32),
        "proj_ln_g": jnp.ones((1, H), jnp.float32),
        "proj_ln_b": jnp.zeros((1, H), jnp.float32),
    }
    return params


def retriever_inf_forward(params, input_ids, attention_mask, cfg):
    # The PyTorch module splits the batch in half only to bound peak memory; the
    # encoder/projection weights are shared, attention is per-sequence and LN is
    # per-token, so the parallel batch-block grid axis (nb=2 here literally
    # mirrors the two halves) is mathematically identical to
    # torch.cat([encode(first_half), encode(second_half)]).
    B, S = input_ids.shape
    H = cfg["hidden"]
    nb = cfg["nb"]
    assert B % nb == 0
    Bb = B // nb

    # token-id gather + position add are glue (data-dependent gather).
    x = params["word_emb"][input_ids] + params["pos_emb"][jnp.arange(S)][None, :, :]
    x_blk = x.reshape(nb, Bb * S, H).astype(jnp.float32)

    # layer-invariant key-padding bias, built once in the wrapper.
    key_bias = jnp.where(attention_mask > 0.5, 0.0, -1e9).astype(jnp.float32)
    key_bias = key_bias.reshape(nb, Bb, S)

    out = pallas_encoder(params, x_blk, key_bias, cfg)          # [nb, Bb, H]
    return out.reshape(B, H)


# ---------------------------------- main ------------------------------------- #

if __name__ == "__main__":
    key = jax.random.PRNGKey(0)
    cfg = CFG
    B, S = cfg["batch"], cfg["seq"]

    params = init_params(jax.random.fold_in(key, 100), cfg)

    input_ids = jax.random.randint(jax.random.fold_in(key, 1),
                                   (B, S), 0, cfg["vocab"], dtype=jnp.int32)
    lengths = jnp.array([8, 6, 7, 5], dtype=jnp.int32)
    attention_mask = (jnp.arange(S)[None, :] < lengths[:, None]).astype(jnp.float32)

    fwd = jax.jit(lambda p, ids, m: retriever_inf_forward(p, ids, m, cfg))
    out = jax.block_until_ready(fwd(params, input_ids, attention_mask))

    assert out.shape == (B, cfg["hidden"]), out.shape
    assert out.dtype == jnp.float32
    assert bool(jnp.all(jnp.isfinite(out)))
    print("KERNEL_OK")
</pallas_src>

<mosaic_0001>
module attributes {stable_mosaic.version = 11 : i64} {
  func.func @_encoder_kernel(%arg0: i32, %arg1: i32, %arg2: memref<1x16x32xf32, #tpu.memory_space<vmem>>, %arg3: memref<1x2x8xf32, #tpu.memory_space<vmem>>, %arg4: memref<1x32xf32, #tpu.memory_space<vmem>>, %arg5: memref<1x32xf32, #tpu.memory_space<vmem>>, %arg6: memref<1x32x96xbf16, #tpu.memory_space<vmem>>, %arg7: memref<1x1x96xf32, #tpu.memory_space<vmem>>, %arg8: memref<1x32x32xbf16, #tpu.memory_space<vmem>>, %arg9: memref<1x1x32xf32, #tpu.memory_space<vmem>>, %arg10: memref<1x1x32xf32, #tpu.memory_space<vmem>>, %arg11: memref<1x1x32xf32, #tpu.memory_space<vmem>>, %arg12: memref<1x32x64xbf16, #tpu.memory_space<vmem>>, %arg13: memref<1x1x64xf32, #tpu.memory_space<vmem>>, %arg14: memref<1x64x32xbf16, #tpu.memory_space<vmem>>, %arg15: memref<1x1x32xf32, #tpu.memory_space<vmem>>, %arg16: memref<1x1x32xf32, #tpu.memory_space<vmem>>, %arg17: memref<1x1x32xf32, #tpu.memory_space<vmem>>, %arg18: memref<32x32xbf16, #tpu.memory_space<vmem>>, %arg19: memref<1x32xf32, #tpu.memory_space<vmem>>, %arg20: memref<1x32xf32, #tpu.memory_space<vmem>>, %arg21: memref<1x32xf32, #tpu.memory_space<vmem>>, %arg22: memref<1x2x32xf32, #tpu.memory_space<vmem>>, %arg23: memref<16x32xf32, #tpu.memory_space<vmem>>) attributes {dimension_semantics = [#tpu.dimension_semantics<parallel>, #tpu.dimension_semantics<arbitrary>], iteration_bounds = array<i64: 2, 2>, scalar_prefetch = 0 : i64, scratch_operands = 1 : i64, tpu.core_type = #tpu.core_type<tc>, window_params = [{transform_indices = @transform_0, window_bounds = array<i64: 1, 16, 32>}, {transform_indices = @transform_1, window_bounds = array<i64: 1, 2, 8>}, {pipeline_mode = #tpu.pipeline_mode<synchronous>, transform_indices = @transform_2, window_bounds = array<i64: 1, 32>}, {pipeline_mode = #tpu.pipeline_mode<synchronous>, transform_indices = @transform_3, window_bounds = array<i64: 1, 32>}, {transform_indices = @transform_4, window_bounds = array<i64: 1, 32, 96>}, {transform_indices = @transform_5, window_bounds = array<i64: 1, 1, 96>}, {transform_indices = @transform_6, window_bounds = array<i64: 1, 32, 32>}, {transform_indices = @transform_7, window_bounds = array<i64: 1, 1, 32>}, {transform_indices = @transform_8, window_bounds = array<i64: 1, 1, 32>}, {transform_indices = @transform_9, window_bounds = array<i64: 1, 1, 32>}, {transform_indices = @transform_10, window_bounds = array<i64: 1, 32, 64>}, {transform_indices = @transform_11, window_bounds = array<i64: 1, 1, 64>}, {transform_indices = @transform_12, window_bounds = array<i64: 1, 64, 32>}, {transform_indices = @transform_13, window_bounds = array<i64: 1, 1, 32>}, {transform_indices = @transform_14, window_bounds = array<i64: 1, 1, 32>}, {transform_indices = @transform_15, window_bounds = array<i64: 1, 1, 32>}, {pipeline_mode = #tpu.pipeline_mode<synchronous>, transform_indices = @transform_16, window_bounds = array<i64: 32, 32>}, {pipeline_mode = #tpu.pipeline_mode<synchronous>, transform_indices = @transform_17, window_bounds = array<i64: 1, 32>}, {pipeline_mode = #tpu.pipeline_mode<synchronous>, transform_indices = @transform_18, window_bounds = array<i64: 1, 32>}, {pipeline_mode = #tpu.pipeline_mode<synchronous>, transform_indices = @transform_19, window_bounds = array<i64: 1, 32>}, {transform_indices = @transform_20, window_bounds = array<i64: 1, 2, 32>}]} {
    %c0_i32 = arith.constant 0 : i32
    %0 = arith.cmpi eq, %arg1, %c0_i32 : i32
    %1 = arith.extui %0 : i1 to i32
    %c0_i32_0 = arith.constant 0 : i32
    %2 = arith.cmpi ne, %1, %c0_i32_0 : i32
    scf.if %2 {
      %c0_77 = arith.constant 0 : index
      %c0_78 = arith.constant 0 : index
      %c0_79 = arith.constant 0 : index
      %200 = vector.load %arg2[%c0_77, %c0_78, %c0_79] : memref<1x16x32xf32, #tpu.memory_space<vmem>>, vector<1x16x32xf32>
      %201 = vector.shape_cast %200 : vector<1x16x32xf32> to vector<16x32xf32>
      %c0_80 = arith.constant 0 : index
      %c0_81 = arith.constant 0 : index
      %202 = vector.load %arg4[%c0_80, %c0_81] : memref<1x32xf32, #tpu.memory_space<vmem>>, vector<1x32xf32>
      %c0_82 = arith.constant 0 : index
      %c0_83 = arith.constant 0 : index
      %203 = vector.load %arg5[%c0_82, %c0_83] : memref<1x32xf32, #tpu.memory_space<vmem>>, vector<1x32xf32>
      %cst_84 = arith.constant dense<0.000000e+00> : vector<16xf32>
      %204 = vector.multi_reduction <add>, %201, %cst_84 [1] : vector<16x32xf32> to vector<16xf32>
      %205 = vector.shape_cast %204 : vector<16xf32> to vector<16x1xf32>
      %cst_85 = arith.constant 3.200000e+01 : f32
      %206 = vector.broadcast %cst_85 : f32 to vector<16x1xf32>
      %207 = arith.divf %205, %206 : vector<16x1xf32>
      %208 = vector.broadcast %207 : vector<16x1xf32> to vector<16x32xf32>
      %209 = arith.subf %201, %208 : vector<16x32xf32>
      %210 = arith.mulf %209, %209 : vector<16x32xf32>
      %cst_86 = arith.constant dense<0.000000e+00> : vector<16xf32>
      %211 = vector.multi_reduction <add>, %210, %cst_86 [1] : vector<16x32xf32> to vector<16xf32>
      %212 = vector.shape_cast %211 : vector<16xf32> to vector<16x1xf32>
      %cst_87 = arith.constant 3.200000e+01 : f32
      %213 = vector.broadcast %cst_87 : f32 to vector<16x1xf32>
      %214 = arith.divf %212, %213 : vector<16x1xf32>
      %215 = vector.broadcast %207 : vector<16x1xf32> to vector<16x32xf32>
      %216 = arith.subf %201, %215 : vector<16x32xf32>
      %cst_88 = arith.constant 9.99999996E-13 : f32
      %217 = vector.broadcast %cst_88 : f32 to vector<16x1xf32>
      %218 = arith.addf %214, %217 : vector<16x1xf32>
      %219 = math.rsqrt %218 : vector<16x1xf32>
      %220 = vector.broadcast %219 : vector<16x1xf32> to vector<16x32xf32>
      %221 = arith.mulf %216, %220 : vector<16x32xf32>
      %222 = vector.broadcast %202 : vector<1x32xf32> to vector<16x32xf32>
      %223 = arith.mulf %221, %222 : vector<16x32xf32>
      %224 = vector.broadcast %203 : vector<1x32xf32> to vector<16x32xf32>
      %225 = arith.addf %223, %224 : vector<16x32xf32>
      %c0_89 = arith.constant 0 : index
      %c0_90 = arith.constant 0 : index
      %226 = vector.load %arg23[%c0_89, %c0_90] : memref<16x32xf32, #tpu.memory_space<vmem>>, vector<16x32xf32>
      tpu.vector_store %arg23[%c0_89, %c0_90], %225 {strides = array<i32>} : memref<16x32xf32, #tpu.memory_space<vmem>>, vector<16x32xf32>,
    } else {
    }
    %c0 = arith.constant 0 : index
    %c0_1 = arith.constant 0 : index
    %3 = vector.load %arg23[%c0, %c0_1] : memref<16x32xf32, #tpu.memory_space<vmem>>, vector<16x32xf32>
    %4 = arith.truncf %3 : vector<16x32xf32> to vector<16x32xbf16>
    %c0_2 = arith.constant 0 : index
    %c0_3 = arith.constant 0 : index
    %c0_4 = arith.constant 0 : index
    %5 = vector.load %arg6[%c0_2, %c0_3, %c0_4] : memref<1x32x96xbf16, #tpu.memory_space<vmem>>, vector<1x32x96xbf16>
    %6 = vector.shape_cast %5 : vector<1x32x96xbf16> to vector<32x96xbf16>
    %cst = arith.constant dense<0.000000e+00> : vector<16x96xf32>
    %7 = tpu.matmul %4, %6, %cst {dimension_numbers = #tpu.dot_dimension_numbers<[1], [0], [0], [1], [0, 0, 1, 1], [], []>} : vector<16x32xbf16>, vector<32x96xbf16>, vector<16x96xf32> -> vector<16x96xf32>
    %c0_5 = arith.constant 0 : index
    %c0_6 = arith.constant 0 : index
    %c0_7 = arith.constant 0 : index
    %8 = vector.load %arg7[%c0_5, %c0_6, %c0_7] : memref<1x1x96xf32, #tpu.memory_space<vmem>>, vector<1x1x96xf32>
    %9 = vector.shape_cast %8 : vector<1x1x96xf32> to vector<1x96xf32>
    %10 = vector.broadcast %9 : vector<1x96xf32> to vector<16x96xf32>
    %11 = arith.addf %7, %10 : vector<16x96xf32>
    %12 = vector.extract_strided_slice %11 {offsets = [0, 0], sizes = [16, 32], strides = [1, 1]} : vector<16x96xf32> to vector<16x32xf32>
    %13 = vector.shape_cast %12 : vector<16x32xf32> to vector<2x8x32xf32>
    %14 = vector.extract_strided_slice %11 {offsets = [0, 32], sizes = [16, 32], strides = [1, 1]} : vector<16x96xf32> to vector<16x32xf32>
    %15 = vector.shape_cast %14 : vector<16x32xf32> to vector<2x8x32xf32>
    %16 = vector.extract_strided_slice %11 {offsets = [0, 64], sizes = [16, 32], strides = [1, 1]} : vector<16x96xf32> to vector<16x32xf32>
    %17 = vector.shape_cast %16 : vector<16x32xf32> to vector<2x8x32xf32>
    %c0_8 = arith.constant 0 : index
    %c0_9 = arith.constant 0 : index
    %c0_10 = arith.constant 0 : index
    %18 = vector.load %arg3[%c0_8, %c0_9, %c0_10] : memref<1x2x8xf32, #tpu.memory_space<vmem>>, vector<1x2x8xf32>
    %19 = vector.shape_cast %18 : vector<1x2x8xf32> to vector<2x8xf32>
    %20 = vector.shape_cast %19 : vector<2x8xf32> to vector<2x1x8xf32>
    %21 = vector.shape_cast %20 : vector<2x1x8xf32> to vector<2x1x8xf32>
    %22 = vector.broadcast %21 : vector<2x1x8xf32> to vector<2x8x8xf32>
    %23 = vector.extract_strided_slice %13 {offsets = [0, 0, 0], sizes = [2, 8, 8], strides = [1, 1, 1]} : vector<2x8x32xf32> to vector<2x8x8xf32>
    %24 = arith.truncf %23 : vector<2x8x8xf32> to vector<2x8x8xbf16>
    %25 = vector.extract_strided_slice %15 {offsets = [0, 0, 0], sizes = [2, 8, 8], strides = [1, 1, 1]} : vector<2x8x32xf32> to vector<2x8x8xf32>
    %26 = arith.truncf %25 : vector<2x8x8xf32> to vector<2x8x8xbf16>
    %27 = vector.extract_strided_slice %17 {offsets = [0, 0, 0], sizes = [2, 8, 8], strides = [1, 1, 1]} : vector<2x8x32xf32> to vector<2x8x8xf32>
    %28 = arith.truncf %27 : vector<2x8x8xf32> to vector<2x8x8xbf16>
    "tpu.trace_start"() <{level = 10 : i32, message = "bqd,bkd->bqk"}> : () -> ()
    %cst_11 = arith.constant dense<0.000000e+00> : vector<2x8x8xf32>
    %29 = tpu.matmul %24, %26, %cst_11 {dimension_numbers = #tpu.dot_dimension_numbers<[2], [2], [1], [1], [0, 0, 0, 1, 1, 1], [0], [0]>} : vector<2x8x8xbf16>, vector<2x8x8xbf16>, vector<2x8x8xf32> -> vector<2x8x8xf32>
    "tpu.trace_stop"() : () -> ()
    %30 = arith.addf %29, %22 : vector<2x8x8xf32>
    %cst_12 = arith.constant dense<0xFF800000> : vector<2x8xf32>
    %31 = vector.multi_reduction <maximumf>, %30, %cst_12 [2] : vector<2x8x8xf32> to vector<2x8xf32>
    %32 = vector.shape_cast %31 : vector<2x8xf32> to vector<2x8x1xf32>
    %33 = vector.broadcast %32 : vector<2x8x1xf32> to vector<2x8x8xf32>
    %34 = arith.subf %30, %33 : vector<2x8x8xf32>
    %35 = math.exp %34 : vector<2x8x8xf32>
    %cst_13 = arith.constant dense<0.000000e+00> : vector<2x8xf32>
    %36 = vector.multi_reduction <add>, %35, %cst_13 [2] : vector<2x8x8xf32> to vector<2x8xf32>
    %37 = vector.shape_cast %36 : vector<2x8xf32> to vector<2x8x1xf32>
    %38 = tpu.reciprocal %37 {approx = true} : vector<2x8x1xf32> -> vector<2x8x1xf32>
    %39 = vector.broadcast %38 : vector<2x8x1xf32> to vector<2x8x8xf32>
    %40 = arith.mulf %35, %39 : vector<2x8x8xf32>
    %41 = arith.truncf %40 : vector<2x8x8xf32> to vector<2x8x8xbf16>
    "tpu.trace_start"() <{level = 10 : i32, message = "bqk,bkd->bqd"}> : () -> ()
    %cst_14 = arith.constant dense<0.000000e+00> : vector<2x8x8xf32>
    %42 = tpu.matmul %41, %28, %cst_14 {dimension_numbers = #tpu.dot_dimension_numbers<[2], [1], [1], [2], [0, 0, 0, 1, 1, 2], [0], [0]>} : vector<2x8x8xbf16>, vector<2x8x8xbf16>, vector<2x8x8xf32> -> vector<2x8x8xf32>
    "tpu.trace_stop"() : () -> ()
    %43 = vector.extract_strided_slice %13 {offsets = [0, 0, 8], sizes = [2, 8, 8], strides = [1, 1, 1]} : vector<2x8x32xf32> to vector<2x8x8xf32>
    %44 = arith.truncf %43 : vector<2x8x8xf32> to vector<2x8x8xbf16>
    %45 = vector.extract_strided_slice %15 {offsets = [0, 0, 8], sizes = [2, 8, 8], strides = [1, 1, 1]} : vector<2x8x32xf32> to vector<2x8x8xf32>
    %46 = arith.truncf %45 : vector<2x8x8xf32> to vector<2x8x8xbf16>
    %47 = vector.extract_strided_slice %17 {offsets = [0, 0, 8], sizes = [2, 8, 8], strides = [1, 1, 1]} : vector<2x8x32xf32> to vector<2x8x8xf32>
    %48 = arith.truncf %47 : vector<2x8x8xf32> to vector<2x8x8xbf16>
    "tpu.trace_start"() <{level = 10 : i32, message = "bqd,bkd->bqk"}> : () -> ()
    %cst_15 = arith.constant dense<0.000000e+00> : vector<2x8x8xf32>
    %49 = tpu.matmul %44, %46, %cst_15 {dimension_numbers = #tpu.dot_dimension_numbers<[2], [2], [1], [1], [0, 0, 0, 1, 1, 1], [0], [0]>} : vector<2x8x8xbf16>, vector<2x8x8xbf16>, vector<2x8x8xf32> -> vector<2x8x8xf32>
    "tpu.trace_stop"() : () -> ()
    %50 = arith.addf %49, %22 : vector<2x8x8xf32>
    %cst_16 = arith.constant dense<0xFF800000> : vector<2x8xf32>
    %51 = vector.multi_reduction <maximumf>, %50, %cst_16 [2] : vector<2x8x8xf32> to vector<2x8xf32>
    %52 = vector.shape_cast %51 : vector<2x8xf32> to vector<2x8x1xf32>
    %53 = vector.broadcast %52 : vector<2x8x1xf32> to vector<2x8x8xf32>
    %54 = arith.subf %50, %53 : vector<2x8x8xf32>
    %55 = math.exp %54 : vector<2x8x8xf32>
    %cst_17 = arith.constant dense<0.000000e+00> : vector<2x8xf32>
    %56 = vector.multi_reduction <add>, %55, %cst_17 [2] : vector<2x8x8xf32> to vector<2x8xf32>
    %57 = vector.shape_cast %56 : vector<2x8xf32> to vector<2x8x1xf32>
    %58 = tpu.reciprocal %57 {approx = true} : vector<2x8x1xf32> -> vector<2x8x1xf32>
    %59 = vector.broadcast %58 : vector<2x8x1xf32> to vector<2x8x8xf32>
    %60 = arith.mulf %55, %59 : vector<2x8x8xf32>
    %61 = arith.truncf %60 : vector<2x8x8xf32> to vector<2x8x8xbf16>
    "tpu.trace_start"() <{level = 10 : i32, message = "bqk,bkd->bqd"}> : () -> ()
    %cst_18 = arith.constant dense<0.000000e+00> : vector<2x8x8xf32>
    %62 = tpu.matmul %61, %48, %cst_18 {dimension_numbers = #tpu.dot_dimension_numbers<[2], [1], [1], [2], [0, 0, 0, 1, 1, 2], [0], [0]>} : vector<2x8x8xbf16>, vector<2x8x8xbf16>, vector<2x8x8xf32> -> vector<2x8x8xf32>
    "tpu.trace_stop"() : () -> ()
    %63 = vector.extract_strided_slice %13 {offsets = [0, 0, 16], sizes = [2, 8, 8], strides = [1, 1, 1]} : vector<2x8x32xf32> to vector<2x8x8xf32>
    %64 = arith.truncf %63 : vector<2x8x8xf32> to vector<2x8x8xbf16>
    %65 = vector.extract_strided_slice %15 {offsets = [0, 0, 16], sizes = [2, 8, 8], strides = [1, 1, 1]} : vector<2x8x32xf32> to vector<2x8x8xf32>
    %66 = arith.truncf %65 : vector<2x8x8xf32> to vector<2x8x8xbf16>
    %67 = vector.extract_strided_slice %17 {offsets = [0, 0, 16], sizes = [2, 8, 8], strides = [1, 1, 1]} : vector<2x8x32xf32> to vector<2x8x8xf32>
    %68 = arith.truncf %67 : vector<2x8x8xf32> to vector<2x8x8xbf16>
    "tpu.trace_start"() <{level = 10 : i32, message = "bqd,bkd->bqk"}> : () -> ()
    %cst_19 = arith.constant dense<0.000000e+00> : vector<2x8x8xf32>
    %69 = tpu.matmul %64, %66, %cst_19 {dimension_numbers = #tpu.dot_dimension_numbers<[2], [2], [1], [1], [0, 0, 0, 1, 1, 1], [0], [0]>} : vector<2x8x8xbf16>, vector<2x8x8xbf16>, vector<2x8x8xf32> -> vector<2x8x8xf32>
    "tpu.trace_stop"() : () -> ()
    %70 = arith.addf %69, %22 : vector<2x8x8xf32>
    %cst_20 = arith.constant dense<0xFF800000> : vector<2x8xf32>
    %71 = vector.multi_reduction <maximumf>, %70, %cst_20 [2] : vector<2x8x8xf32> to vector<2x8xf32>
    %72 = vector.shape_cast %71 : vector<2x8xf32> to vector<2x8x1xf32>
    %73 = vector.broadcast %72 : vector<2x8x1xf32> to vector<2x8x8xf32>
    %74 = arith.subf %70, %73 : vector<2x8x8xf32>
    %75 = math.exp %74 : vector<2x8x8xf32>
    %cst_21 = arith.constant dense<0.000000e+00> : vector<2x8xf32>
    %76 = vector.multi_reduction <add>, %75, %cst_21 [2] : vector<2x8x8xf32> to vector<2x8xf32>
    %77 = vector.shape_cast %76 : vector<2x8xf32> to vector<2x8x1xf32>
    %78 = tpu.reciprocal %77 {approx = true} : vector<2x8x1xf32> -> vector<2x8x1xf32>
    %79 = vector.broadcast %78 : vector<2x8x1xf32> to vector<2x8x8xf32>
    %80 = arith.mulf %75, %79 : vector<2x8x8xf32>
    %81 = arith.truncf %80 : vector<2x8x8xf32> to vector<2x8x8xbf16>
    "tpu.trace_start"() <{level = 10 : i32, message = "bqk,bkd->bqd"}> : () -> ()
    %cst_22 = arith.constant dense<0.000000e+00> : vector<2x8x8xf32>
    %82 = tpu.matmul %81, %68, %cst_22 {dimension_numbers = #tpu.dot_dimension_numbers<[2], [1], [1], [2], [0, 0, 0, 1, 1, 2], [0], [0]>} : vector<2x8x8xbf16>, vector<2x8x8xbf16>, vector<2x8x8xf32> -> vector<2x8x8xf32>
    "tpu.trace_stop"() : () -> ()
    %83 = vector.extract_strided_slice %13 {offsets = [0, 0, 24], sizes = [2, 8, 8], strides = [1, 1, 1]} : vector<2x8x32xf32> to vector<2x8x8xf32>
    %84 = arith.truncf %83 : vector<2x8x8xf32> to vector<2x8x8xbf16>
    %85 = vector.extract_strided_slice %15 {offsets = [0, 0, 24], sizes = [2, 8, 8], strides = [1, 1, 1]} : vector<2x8x32xf32> to vector<2x8x8xf32>
    %86 = arith.truncf %85 : vector<2x8x8xf32> to vector<2x8x8xbf16>
    %87 = vector.extract_strided_slice %17 {offsets = [0, 0, 24], sizes = [2, 8, 8], strides = [1, 1, 1]} : vector<2x8x32xf32> to vector<2x8x8xf32>
    %88 = arith.truncf %87 : vector<2x8x8xf32> to vector<2x8x8xbf16>
    "tpu.trace_start"() <{level = 10 : i32, message = "bqd,bkd->bqk"}> : () -> ()
    %cst_23 = arith.constant dense<0.000000e+00> : vector<2x8x8xf32>
    %89 = tpu.matmul %84, %86, %cst_23 {dimension_numbers = #tpu.dot_dimension_numbers<[2], [2], [1], [1], [0, 0, 0, 1, 1, 1], [0], [0]>} : vector<2x8x8xbf16>, vector<2x8x8xbf16>, vector<2x8x8xf32> -> vector<2x8x8xf32>
    "tpu.trace_stop"() : () -> ()
    %90 = arith.addf %89, %22 : vector<2x8x8xf32>
    %cst_24 = arith.constant dense<0xFF800000> : vector<2x8xf32>
    %91 = vector.multi_reduction <maximumf>, %90, %cst_24 [2] : vector<2x8x8xf32> to vector<2x8xf32>
    %92 = vector.shape_cast %91 : vector<2x8xf32> to vector<2x8x1xf32>
    %93 = vector.broadcast %92 : vector<2x8x1xf32> to vector<2x8x8xf32>
    %94 = arith.subf %90, %93 : vector<2x8x8xf32>
    %95 = math.exp %94 : vector<2x8x8xf32>
    %cst_25 = arith.constant dense<0.000000e+00> : vector<2x8xf32>
    %96 = vector.multi_reduction <add>, %95, %cst_25 [2] : vector<2x8x8xf32> to vector<2x8xf32>
    %97 = vector.shape_cast %96 : vector<2x8xf32> to vector<2x8x1xf32>
    %98 = tpu.reciprocal %97 {approx = true} : vector<2x8x1xf32> -> vector<2x8x1xf32>
    %99 = vector.broadcast %98 : vector<2x8x1xf32> to vector<2x8x8xf32>
    %100 = arith.mulf %95, %99 : vector<2x8x8xf32>
    %101 = arith.truncf %100 : vector<2x8x8xf32> to vector<2x8x8xbf16>
    "tpu.trace_start"() <{level = 10 : i32, message = "bqk,bkd->bqd"}> : () -> ()
    %cst_26 = arith.constant dense<0.000000e+00> : vector<2x8x8xf32>
    %102 = tpu.matmul %101, %88, %cst_26 {dimension_numbers = #tpu.dot_dimension_numbers<[2], [1], [1], [2], [0, 0, 0, 1, 1, 2], [0], [0]>} : vector<2x8x8xbf16>, vector<2x8x8xbf16>, vector<2x8x8xf32> -> vector<2x8x8xf32>
    "tpu.trace_stop"() : () -> ()
    %103 = tpu.concatenate %42, %62, %82, %102 in 2 : vector<2x8x8xf32>, vector<2x8x8xf32>, vector<2x8x8xf32>, vector<2x8x8xf32> -> vector<2x8x32xf32>
    %104 = vector.shape_cast %103 : vector<2x8x32xf32> to vector<16x32xf32>
    %105 = arith.truncf %104 : vector<16x32xf32> to vector<16x32xbf16>
    %c0_27 = arith.constant 0 : index
    %c0_28 = arith.constant 0 : index
    %c0_29 = arith.constant 0 : index
    %106 = vector.load %arg8[%c0_27, %c0_28, %c0_29] : memref<1x32x32xbf16, #tpu.memory_space<vmem>>, vector<1x32x32xbf16>
    %107 = vector.shape_cast %106 : vector<1x32x32xbf16> to vector<32x32xbf16>
    %cst_30 = arith.constant dense<0.000000e+00> : vector<16x32xf32>
    %108 = tpu.matmul %105, %107, %cst_30 {dimension_numbers = #tpu.dot_dimension_numbers<[1], [0], [0], [1], [0, 0, 1, 1], [], []>} : vector<16x32xbf16>, vector<32x32xbf16>, vector<16x32xf32> -> vector<16x32xf32>
    %c0_31 = arith.constant 0 : index
    %c0_32 = arith.constant 0 : index
    %c0_33 = arith.constant 0 : index
    %109 = vector.load %arg9[%c0_31, %c0_32, %c0_33] : memref<1x1x32xf32, #tpu.memory_space<vmem>>, vector<1x1x32xf32>
    %110 = vector.shape_cast %109 : vector<1x1x32xf32> to vector<1x32xf32>
    %111 = vector.broadcast %110 : vector<1x32xf32> to vector<16x32xf32>
    %112 = arith.addf %108, %111 : vector<16x32xf32>
    %113 = arith.addf %3, %112 : vector<16x32xf32>
    %c0_34 = arith.constant 0 : index
    %c0_35 = arith.constant 0 : index
    %c0_36 = arith.constant 0 : index
    %114 = vector.load %arg10[%c0_34, %c0_35, %c0_36] : memref<1x1x32xf32, #tpu.memory_space<vmem>>, vector<1x1x32xf32>
    %115 = vector.shape_cast %114 : vector<1x1x32xf32> to vector<1x32xf32>
    %c0_37 = arith.constant 0 : index
    %c0_38 = arith.constant 0 : index
    %c0_39 = arith.constant 0 : index
    %116 = vector.load %arg11[%c0_37, %c0_38, %c0_39] : memref<1x1x32xf32, #tpu.memory_space<vmem>>, vector<1x1x32xf32>
    %117 = vector.shape_cast %116 : vector<1x1x32xf32> to vector<1x32xf32>
    %cst_40 = arith.constant dense<0.000000e+00> : vector<16xf32>
    %118 = vector.multi_reduction <add>, %113, %cst_40 [1] : vector<16x32xf32> to vector<16xf32>
    %119 = vector.shape_cast %118 : vector<16xf32> to vector<16x1xf32>
    %cst_41 = arith.constant 3.200000e+01 : f32
    %120 = vector.broadcast %cst_41 : f32 to vector<16x1xf32>
    %121 = arith.divf %119, %120 : vector<16x1xf32>
    %122 = vector.broadcast %121 : vector<16x1xf32> to vector<16x32xf32>
    %123 = arith.subf %113, %122 : vector<16x32xf32>
    %124 = arith.mulf %123, %123 : vector<16x32xf32>
    %cst_42 = arith.constant dense<0.000000e+00> : vector<16xf32>
    %125 = vector.multi_reduction <add>, %124, %cst_42 [1] : vector<16x32xf32> to vector<16xf32>
    %126 = vector.shape_cast %125 : vector<16xf32> to vector<16x1xf32>
    %cst_43 = arith.constant 3.200000e+01 : f32
    %127 = vector.broadcast %cst_43 : f32 to vector<16x1xf32>
    %128 = arith.divf %126, %127 : vector<16x1xf32>
    %129 = vector.broadcast %121 : vector<16x1xf32> to vector<16x32xf32>
    %130 = arith.subf %113, %129 : vector<16x32xf32>
    %cst_44 = arith.constant 9.99999996E-13 : f32
    %131 = vector.broadcast %cst_44 : f32 to vector<16x1xf32>
    %132 = arith.addf %128, %131 : vector<16x1xf32>
    %133 = math.rsqrt %132 : vector<16x1xf32>
    %134 = vector.broadcast %133 : vector<16x1xf32> to vector<16x32xf32>
    %135 = arith.mulf %130, %134 : vector<16x32xf32>
    %136 = vector.broadcast %115 : vector<1x32xf32> to vector<16x32xf32>
    %137 = arith.mulf %135, %136 : vector<16x32xf32>
    %138 = vector.broadcast %117 : vector<1x32xf32> to vector<16x32xf32>
    %139 = arith.addf %137, %138 : vector<16x32xf32>
    %140 = arith.truncf %139 : vector<16x32xf32> to vector<16x32xbf16>
    %c0_45 = arith.constant 0 : index
    %c0_46 = arith.constant 0 : index
    %c0_47 = arith.constant 0 : index
    %141 = vector.load %arg12[%c0_45, %c0_46, %c0_47] : memref<1x32x64xbf16, #tpu.memory_space<vmem>>, vector<1x32x64xbf16>
    %142 = vector.shape_cast %141 : vector<1x32x64xbf16> to vector<32x64xbf16>
    %cst_48 = arith.constant dense<0.000000e+00> : vector<16x64xf32>
    %143 = tpu.matmul %140, %142, %cst_48 {dimension_numbers = #tpu.dot_dimension_numbers<[1], [0], [0], [1], [0, 0, 1, 1], [], []>} : vector<16x32xbf16>, vector<32x64xbf16>, vector<16x64xf32> -> vector<16x64xf32>
    %c0_49 = arith.constant 0 : index
    %c0_50 = arith.constant 0 : index
    %c0_51 = arith.constant 0 : index
    %144 = vector.load %arg13[%c0_49, %c0_50, %c0_51] : memref<1x1x64xf32, #tpu.memory_space<vmem>>, vector<1x1x64xf32>
    %145 = vector.shape_cast %144 : vector<1x1x64xf32> to vector<1x64xf32>
    %146 = vector.broadcast %145 : vector<1x64xf32> to vector<16x64xf32>
    %147 = arith.addf %143, %146 : vector<16x64xf32>
    %cst_52 = arith.constant 5.000000e-01 : f32
    %148 = vector.broadcast %cst_52 : f32 to vector<16x64xf32>
    %149 = arith.mulf %148, %147 : vector<16x64xf32>
    %cst_53 = arith.constant 4.471500e-02 : f32
    %150 = vector.broadcast %cst_53 : f32 to vector<16x64xf32>
    %151 = arith.mulf %150, %147 : vector<16x64xf32>
    %152 = arith.mulf %151, %147 : vector<16x64xf32>
    %153 = arith.mulf %152, %147 : vector<16x64xf32>
    %154 = arith.addf %147, %153 : vector<16x64xf32>
    %cst_54 = arith.constant 0.797884583 : f32
    %155 = vector.broadcast %cst_54 : f32 to vector<16x64xf32>
    %156 = arith.mulf %155, %154 : vector<16x64xf32>
    %157 = math.tanh %156 : vector<16x64xf32>
    %cst_55 = arith.constant 1.000000e+00 : f32
    %158 = vector.broadcast %cst_55 : f32 to vector<16x64xf32>
    %159 = arith.addf %158, %157 : vector<16x64xf32>
    %160 = arith.mulf %149, %159 : vector<16x64xf32>
    %161 = arith.truncf %160 : vector<16x64xf32> to vector<16x64xbf16>
    %c0_56 = arith.constant 0 : index
    %c0_57 = arith.constant 0 : index
    %c0_58 = arith.constant 0 : index
    %162 = vector.load %arg14[%c0_56, %c0_57, %c0_58] : memref<1x64x32xbf16, #tpu.memory_space<vmem>>, vector<1x64x32xbf16>
    %163 = vector.shape_cast %162 : vector<1x64x32xbf16> to vector<64x32xbf16>
    %cst_59 = arith.constant dense<0.000000e+00> : vector<16x32xf32>
    %164 = tpu.matmul %161, %163, %cst_59 {dimension_numbers = #tpu.dot_dimension_numbers<[1], [0], [0], [1], [0, 0, 1, 1], [], []>} : vector<16x64xbf16>, vector<64x32xbf16>, vector<16x32xf32> -> vector<16x32xf32>
    %c0_60 = arith.constant 0 : index
    %c0_61 = arith.constant 0 : index
    %c0_62 = arith.constant 0 : index
    %165 = vector.load %arg15[%c0_60, %c0_61, %c0_62] : memref<1x1x32xf32, #tpu.memory_space<vmem>>, vector<1x1x32xf32>
    %166 = vector.shape_cast %165 : vector<1x1x32xf32> to vector<1x32xf32>
    %167 = vector.broadcast %166 : vector<1x32xf32> to vector<16x32xf32>
    %168 = arith.addf %164, %167 : vector<16x32xf32>
    %169 = arith.addf %139, %168 : vector<16x32xf32>
    %c0_63 = arith.constant 0 : index
    %c0_64 = arith.constant 0 : index
    %c0_65 = arith.constant 0 : index
    %170 = vector.load %arg16[%c0_63, %c0_64, %c0_65] : memref<1x1x32xf32, #tpu.memory_space<vmem>>, vector<1x1x32xf32>
    %171 = vector.shape_cast %170 : vector<1x1x32xf32> to vector<1x32xf32>
    %c0_66 = arith.constant 0 : index
    %c0_67 = arith.constant 0 : index
    %c0_68 = arith.constant 0 : index
    %172 = vector.load %arg17[%c0_66, %c0_67, %c0_68] : memref<1x1x32xf32, #tpu.memory_space<vmem>>, vector<1x1x32xf32>
    %173 = vector.shape_cast %172 : vector<1x1x32xf32> to vector<1x32xf32>
    %cst_69 = arith.constant dense<0.000000e+00> : vector<16xf32>
    %174 = vector.multi_reduction <add>, %169, %cst_69 [1] : vector<16x32xf32> to vector<16xf32>
    %175 = vector.shape_cast %174 : vector<16xf32> to vector<16x1xf32>
    %cst_70 = arith.constant 3.200000e+01 : f32
    %176 = vector.broadcast %cst_70 : f32 to vector<16x1xf32>
    %177 = arith.divf %175, %176 : vector<16x1xf32>
    %178 = vector.broadcast %177 : vector<16x1xf32> to vector<16x32xf32>
    %179 = arith.subf %169, %178 : vector<16x32xf32>
    %180 = arith.mulf %179, %179 : vector<16x32xf32>
    %cst_71 = arith.constant dense<0.000000e+00> : vector<16xf32>
    %181 = vector.multi_reduction <add>, %180, %cst_71 [1] : vector<16x32xf32> to vector<16xf32>
    %182 = vector.shape_cast %181 : vector<16xf32> to vector<16x1xf32>
    %cst_72 = arith.constant 3.200000e+01 : f32
    %183 = vector.broadcast %cst_72 : f32 to vector<16x1xf32>
    %184 = arith.divf %182, %183 : vector<16x1xf32>
    %185 = vector.broadcast %177 : vector<16x1xf32> to vector<16x32xf32>
    %186 = arith.subf %169, %185 : vector<16x32xf32>
    %cst_73 = arith.constant 9.99999996E-13 : f32
    %187 = vector.broadcast %cst_73 : f32 to vector<16x1xf32>
    %188 = arith.addf %184, %187 : vector<16x1xf32>
    %189 = math.rsqrt %188 : vector<16x1xf32>
    %190 = vector.broadcast %189 : vector<16x1xf32> to vector<16x32xf32>
    %191 = arith.mulf %186, %190 : vector<16x32xf32>
    %192 = vector.broadcast %171 : vector<1x32xf32> to vector<16x32xf32>
    %193 = arith.mulf %191, %192 : vector<16x32xf32>
    %194 = vector.broadcast %173 : vector<1x32xf32> to vector<16x32xf32>
    %195 = arith.addf %193, %194 : vector<16x32xf32>
    %c0_74 = arith.constant 0 : index
    %c0_75 = arith.constant 0 : index
    %196 = vector.load %arg23[%c0_74, %c0_75] : memref<16x32xf32, #tpu.memory_space<vmem>>, vector<16x32xf32>
    tpu.vector_store %arg23[%c0_74, %c0_75], %195 {strides = array<i32>} : memref<16x32xf32, #tpu.memory_space<vmem>>, vector<16x32xf32>,
    %c1_i32 = arith.constant 1 : i32
    %197 = arith.cmpi eq, %arg1, %c1_i32 : i32
    %198 = arith.extui %197 : i1 to i32
    %c0_i32_76 = arith.constant 0 : i32
    %199 = arith.cmpi ne, %198, %c0_i32_76 : i32
    scf.if %199 {
      %200 = vector.shape_cast %195 : vector<16x32xf32> to vector<2x8x32xf32>
      %201 = vector.extract_strided_slice %200 {offsets = [0, 0, 0], sizes = [2, 1, 32], strides = [1, 1, 1]} : vector<2x8x32xf32> to vector<2x1x32xf32>
      %202 = vector.shape_cast %201 : vector<2x1x32xf32> to vector<2x32xf32>
      %203 = arith.truncf %202 : vector<2x32xf32> to vector<2x32xbf16>
      %c0_77 = arith.constant 0 : index
      %c0_78 = arith.constant 0 : index
      %204 = vector.load %arg18[%c0_77, %c0_78] : memref<32x32xbf16, #tpu.memory_space<vmem>>, vector<32x32xbf16>
      %cst_79 = arith.constant dense<0.000000e+00> : vector<2x32xf32>
      %205 = tpu.matmul %203, %204, %cst_79 {dimension_numbers = #tpu.dot_dimension_numbers<[1], [0], [0], [1], [0, 0, 1, 1], [], []>} : vector<2x32xbf16>, vector<32x32xbf16>, vector<2x32xf32> -> vector<2x32xf32>
      %c0_80 = arith.constant 0 : index
      %c0_81 = arith.constant 0 : index
      %206 = vector.load %arg19[%c0_80, %c0_81] : memref<1x32xf32, #tpu.memory_space<vmem>>, vector<1x32xf32>
      %207 = vector.broadcast %206 : vector<1x32xf32> to vector<2x32xf32>
      %208 = arith.addf %205, %207 : vector<2x32xf32>
      %c0_82 = arith.constant 0 : index
      %c0_83 = arith.constant 0 : index
      %209 = vector.load %arg20[%c0_82, %c0_83] : memref<1x32xf32, #tpu.memory_space<vmem>>, vector<1x32xf32>
      %c0_84 = arith.constant 0 : index
      %c0_85 = arith.constant 0 : index
      %210 = vector.load %arg21[%c0_84, %c0_85] : memref<1x32xf32, #tpu.memory_space<vmem>>, vector<1x32xf32>
      %cst_86 = arith.constant dense<0.000000e+00> : vector<2xf32>
      %211 = vector.multi_reduction <add>, %208, %cst_86 [1] : vector<2x32xf32> to vector<2xf32>
      %212 = vector.shape_cast %211 : vector<2xf32> to vector<2x1xf32>
      %cst_87 = arith.constant 3.200000e+01 : f32
      %213 = vector.broadcast %cst_87 : f32 to vector<2x1xf32>
      %214 = arith.divf %212, %213 : vector<2x1xf32>
      %215 = vector.broadcast %214 : vector<2x1xf32> to vector<2x32xf32>
      %216 = arith.subf %208, %215 : vector<2x32xf32>
      %217 = arith.mulf %216, %216 : vector<2x32xf32>
      %cst_88 = arith.constant dense<0.000000e+00> : vector<2xf32>
      %218 = vector.multi_reduction <add>, %217, %cst_88 [1] : vector<2x32xf32> to vector<2xf32>
      %219 = vector.shape_cast %218 : vector<2xf32> to vector<2x1xf32>
      %cst_89 = arith.constant 3.200000e+01 : f32
      %220 = vector.broadcast %cst_89 : f32 to vector<2x1xf32>
      %221 = arith.divf %219, %220 : vector<2x1xf32>
      %222 = vector.broadcast %214 : vector<2x1xf32> to vector<2x32xf32>
      %223 = arith.subf %208, %222 : vector<2x32xf32>
      %cst_90 = arith.constant 9.99999996E-13 : f32
      %224 = vector.broadcast %cst_90 : f32 to vector<2x1xf32>
      %225 = arith.addf %221, %224 : vector<2x1xf32>
      %226 = math.rsqrt %225 : vector<2x1xf32>
      %227 = vector.broadcast %226 : vector<2x1xf32> to vector<2x32xf32>
      %228 = arith.mulf %223, %227 : vector<2x32xf32>
      %229 = vector.broadcast %209 : vector<1x32xf32> to vector<2x32xf32>
      %230 = arith.mulf %228, %229 : vector<2x32xf32>
      %231 = vector.broadcast %210 : vector<1x32xf32> to vector<2x32xf32>
      %232 = arith.addf %230, %231 : vector<2x32xf32>
      %c0_91 = arith.constant 0 : index
      %c0_92 = arith.constant 0 : index
      %c0_93 = arith.constant 0 : index
      %233 = vector.load %arg22[%c0_91, %c0_92, %c0_93] : memref<1x2x32xf32, #tpu.memory_space<vmem>>, vector<1x2x32xf32>
      %234 = vector.shape_cast %233 : vector<1x2x32xf32> to vector<2x32xf32>
      %235 = vector.shape_cast %232 : vector<2x32xf32> to vector<1x2x32xf32>
      tpu.vector_store %arg22[%c0_91, %c0_92, %c0_93], %235 {strides = array<i32>} : memref<1x2x32xf32, #tpu.memory_space<vmem>>, vector<1x2x32xf32>,
    } else {
    }
    return
  }
  func.func @transform_0(%arg0: i32, %arg1: i32) -> (i32, i32, i32) {
    %c0_i32 = arith.constant 0 : i32
    %c0_i32_0 = arith.constant 0 : i32
    %c0_i32_1 = arith.constant 0 : i32
    return %arg0, %c0_i32, %c0_i32_0 : i32, i32, i32
  }
  func.func @transform_1(%arg0: i32, %arg1: i32) -> (i32, i32, i32) {
    %c0_i32 = arith.constant 0 : i32
    %c0_i32_0 = arith.constant 0 : i32
    %c0_i32_1 = arith.constant 0 : i32
    return %arg0, %c0_i32, %c0_i32_0 : i32, i32, i32
  }
  func.func @transform_2(%arg0: i32, %arg1: i32) -> (i32, i32) {
    %c0_i32 = arith.constant 0 : i32
    %c0_i32_0 = arith.constant 0 : i32
    %c0_i32_1 = arith.constant 0 : i32
    return %c0_i32, %c0_i32_0 : i32, i32
  }
  func.func @transform_3(%arg0: i32, %arg1: i32) -> (i32, i32) {
    %c0_i32 = arith.constant 0 : i32
    %c0_i32_0 = arith.constant 0 : i32
    %c0_i32_1 = arith.constant 0 : i32
    return %c0_i32, %c0_i32_0 : i32, i32
  }
  func.func @transform_4(%arg0: i32, %arg1: i32) -> (i32, i32, i32) {
    %c0_i32 = arith.constant 0 : i32
    %c0_i32_0 = arith.constant 0 : i32
    %c0_i32_1 = arith.constant 0 : i32
    return %arg1, %c0_i32, %c0_i32_0 : i32, i32, i32
  }
  func.func @transform_5(%arg0: i32, %arg1: i32) -> (i32, i32, i32) {
    %c0_i32 = arith.constant 0 : i32
    %c0_i32_0 = arith.constant 0 : i32
    %c0_i32_1 = arith.constant 0 : i32
    return %arg1, %c0_i32, %c0_i32_0 : i32, i32, i32
  }
  func.func @transform_6(%arg0: i32, %arg1: i32) -> (i32, i32, i32) {
    %c0_i32 = arith.constant 0 : i32
    %c0_i32_0 = arith.constant 0 : i32
    %c0_i32_1 = arith.constant 0 : i32
    return %arg1, %c0_i32, %c0_i32_0 : i32, i32, i32
  }
  func.func @transform_7(%arg0: i32, %arg1: i32) -> (i32, i32, i32) {
    %c0_i32 = arith.constant 0 : i32
    %c0_i32_0 = arith.constant 0 : i32
    %c0_i32_1 = arith.constant 0 : i32
    return %arg1, %c0_i32, %c0_i32_0 : i32, i32, i32
  }
  func.func @transform_8(%arg0: i32, %arg1: i32) -> (i32, i32, i32) {
    %c0_i32 = arith.constant 0 : i32
    %c0_i32_0 = arith.constant 0 : i32
    %c0_i32_1 = arith.constant 0 : i32
    return %arg1, %c0_i32, %c0_i32_0 : i32, i32, i32
  }
  func.func @transform_9(%arg0: i32, %arg1: i32) -> (i32, i32, i32) {
    %c0_i32 = arith.constant 0 : i32
    %c0_i32_0 = arith.constant 0 : i32
    %c0_i32_1 = arith.constant 0 : i32
    return %arg1, %c0_i32, %c0_i32_0 : i32, i32, i32
  }
  func.func @transform_10(%arg0: i32, %arg1: i32) -> (i32, i32, i32) {
    %c0_i32 = arith.constant 0 : i32
    %c0_i32_0 = arith.constant 0 : i32
    %c0_i32_1 = arith.constant 0 : i32
    return %arg1, %c0_i32, %c0_i32_0 : i32, i32, i32
  }
  func.func @transform_11(%arg0: i32, %arg1: i32) -> (i32, i32, i32) {
    %c0_i32 = arith.constant 0 : i32
    %c0_i32_0 = arith.constant 0 : i32
    %c0_i32_1 = arith.constant 0 : i32
    return %arg1, %c0_i32, %c0_i32_0 : i32, i32, i32
  }
  func.func @transform_12(%arg0: i32, %arg1: i32) -> (i32, i32, i32) {
    %c0_i32 = arith.constant 0 : i32
    %c0_i32_0 = arith.constant 0 : i32
    %c0_i32_1 = arith.constant 0 : i32
    return %arg1, %c0_i32, %c0_i32_0 : i32, i32, i32
  }
  func.func @transform_13(%arg0: i32, %arg1: i32) -> (i32, i32, i32) {
    %c0_i32 = arith.constant 0 : i32
    %c0_i32_0 = arith.constant 0 : i32
    %c0_i32_1 = arith.constant 0 : i32
    return %arg1, %c0_i32, %c0_i32_0 : i32, i32, i32
  }
  func.func @transform_14(%arg0: i32, %arg1: i32) -> (i32, i32, i32) {
    %c0_i32 = arith.constant 0 : i32
    %c0_i32_0 = arith.constant 0 : i32
    %c0_i32_1 = arith.constant 0 : i32
    return %arg1, %c0_i32, %c0_i32_0 : i32, i32, i32
  }
  func.func @transform_15(%arg0: i32, %arg1: i32) -> (i32, i32, i32) {
    %c0_i32 = arith.constant 0 : i32
    %c0_i32_0 = arith.constant 0 : i32
    %c0_i32_1 = arith.constant 0 : i32
    return %arg1, %c0_i32, %c0_i32_0 : i32, i32, i32
  }
  func.func @transform_16(%arg0: i32, %arg1: i32) -> (i32, i32) {
    %c0_i32 = arith.constant 0 : i32
    %c0_i32_0 = arith.constant 0 : i32
    %c0_i32_1 = arith.constant 0 : i32
    return %c0_i32, %c0_i32_0 : i32, i32
  }
  func.func @transform_17(%arg0: i32, %arg1: i32) -> (i32, i32) {
    %c0_i32 = arith.constant 0 : i32
    %c0_i32_0 = arith.constant 0 : i32
    %c0_i32_1 = arith.constant 0 : i32
    return %c0_i32, %c0_i32_0 : i32, i32
  }
  func.func @transform_18(%arg0: i32, %arg1: i32) -> (i32, i32) {
    %c0_i32 = arith.constant 0 : i32
    %c0_i32_0 = arith.constant 0 : i32
    %c0_i32_1 = arith.constant 0 : i32
    return %c0_i32, %c0_i32_0 : i32, i32
  }
  func.func @transform_19(%arg0: i32, %arg1: i32) -> (i32, i32) {
    %c0_i32 = arith.constant 0 : i32
    %c0_i32_0 = arith.constant 0 : i32
    %c0_i32_1 = arith.constant 0 : i32
    return %c0_i32, %c0_i32_0 : i32, i32
  }
  func.func @transform_20(%arg0: i32, %arg1: i32) -> (i32, i32, i32) {
    %c0_i32 = arith.constant 0 : i32
    %c0_i32_0 = arith.constant 0 : i32
    %c0_i32_1 = arith.constant 0 : i32
    return %arg0, %c0_i32, %c0_i32_0 : i32, i32, i32
  }
}

</mosaic_0001>

<bundles_post_ra>
// kernel: _lambda_.1
= control target key start
LH: loop header
LB: loop body
LE: loop exit
PB: predicated region body
PF: predicated region fallthrough
CT: control target
= control target key end

     0   :  { %s3703_s0 = inlined_call_operand.vmem [shape: f32[2,16,32], index: 0, kind: input, shape index: {}]   ;;  %s3704_s1 = inlined_call_operand.vmem [shape: f32[2,2,8], index: 1, kind: input, shape index: {}]   ;;  %s3705_s2 = inlined_call_operand.vmem [shape: f32[1,32], index: 2, kind: input, shape index: {}]   ;;  %s3706_s3 = inlined_call_operand.vmem [shape: f32[1,32], index: 3, kind: input, shape index: {}]   ;;  %s3707_s4 = inlined_call_operand.vmem [shape: bf16[2,32,96], index: 4, kind: input, shape index: {}]   ;;  %s3708_s5 = inlined_call_operand.vmem [shape: f32[2,1,96], index: 5, kind: input, shape index: {}]   ;;  %s3709_s6 = inlined_call_operand.vmem [shape: bf16[2,32,32], index: 6, kind: input, shape index: {}]   ;;  %s3710_s7 = inlined_call_operand.vmem [shape: f32[2,1,32], index: 7, kind: input, shape index: {}]   ;;  %s3711_s8 = inlined_call_operand.vmem [shape: f32[2,1,32], index: 8, kind: input, shape index: {}]   ;;  %s3712_s9 = inlined_call_operand.vmem [shape: f32[2,1,32], index: 9, kind: input, shape index: {}]   ;;  %s3713_s10 = inlined_call_operand.vmem [shape: bf16[2,32,64], index: 10, kind: input, shape index: {}]   ;;  %s3714_s11 = inlined_call_operand.vmem [shape: f32[2,1,64], index: 11, kind: input, shape index: {}]   ;;  %s3715_s12 = inlined_call_operand.vmem [shape: bf16[2,64,32], index: 12, kind: input, shape index: {}]   ;;  %s3716_s13 = inlined_call_operand.vmem [shape: f32[2,1,32], index: 13, kind: input, shape index: {}]   ;;  %s3717_s14 = inlined_call_operand.vmem [shape: f32[2,1,32], index: 14, kind: input, shape index: {}]   ;;  %s3718_s15 = inlined_call_operand.vmem [shape: f32[2,1,32], index: 15, kind: input, shape index: {}]   ;;  %s3719_s16 = inlined_call_operand.vmem [shape: bf16[32,32], index: 16, kind: input, shape index: {}]   ;;  %s3720_s17 = inlined_call_operand.vmem [shape: f32[1,32], index: 17, kind: input, shape index: {}]   ;;  %s3721_s18 = inlined_call_operand.vmem [shape: f32[1,32], index: 18, kind: input, shape index: {}]   ;;  %s3722_s19 = inlined_call_operand.vmem [shape: f32[1,32], index: 19, kind: input, shape index: {}]   ;;  %s3723_s20 = inlined_call_operand.hbm [shape: f32[2,2,32], index: 20, kind: output, shape index: {}]  }
   0x1   :  { %3741 = sst [smem:[#allocation20_spill]] %s3703_s0 }
   0x2   :  { %3742 = sst [smem:[#allocation21_spill]] %s3704_s1 }
   0x3   :  { %3743 = sst [smem:[#allocation22_spill]] %s3705_s2 }
   0x4   :  { %3744 = sst [smem:[#allocation23_spill]] %s3706_s3 }
   0x5   :  { %3745 = sst [smem:[#allocation24_spill]] %s3707_s4 }
   0x6   :  { %3746 = sst [smem:[#allocation25_spill]] %s3709_s6 }
   0x7   :  { %3747 = sst [smem:[#allocation26_spill]] %s3713_s10 }
   0x8   :  { %3748 = sst [smem:[#allocation27_spill]] %s3718_s15 }
   0x9   :  { %3749 = sst [smem:[#allocation28_spill]] %s3719_s16 }
   0xa   :  { %3750 = sst [smem:[#allocation29_spill]] %s3720_s17 }
   0xb   :  { %3751 = sst [smem:[#allocation30_spill]] %s3721_s18 }
   0xc   :  { %3752 = sst [smem:[#allocation31_spill]] %s3722_s19 }
   0xd   :  { %3753 = sst [smem:[#allocation32_spill]] %s3723_s20 }
   0xe   :  { %25 = vsyncpa [#allocation4], 0 }
   0xf   :  { %27 = vsyncpa [#allocation4 + $0x1], 0  ;;  %s3234_s1 = smov 0   ;;  %s3236_s22 = smov 0  }
  0x10   :  { %s3238_s23 = smov 0   ;;  %s3240_s24 = smov 0  }
  0x11   :  { %s3242_s2 = smov 0   ;;  %s3244_s25 = smov 0  }
  0x12   :  { %s3246_s3 = smov 0   ;;  %s3248_s26 = smov 0  }
  0x13 LB: > { %3754 = sst [smem:[#allocation6_spill]] %s3079_s1  ;;  %s2584_s27 = sadd.s32 4294967295, %s3107_s26   ;;  %s3107_s26 = sphi %s3248_s26, %s33_s26   ;;  %s3103_s3 = sphi %s3246_s3, %s3804_s3   ;;  %s3099_s25 = sphi %s3244_s25, %s3803_s25   ;;  %s3095_s2 = sphi %s3242_s2, %s3802_s2   ;;  %s3091_s24 = sphi %s3240_s24, %s3801_s24   ;;  %s3087_s23 = sphi %s3238_s23, %s3800_s23   ;;  %s3083_s22 = sphi %s3236_s22, %s3799_s22   ;;  %s3079_s1 = sphi %s3234_s1, %s3798_s1  }
  0x14   : > { %3755 = sst [smem:[#allocation7_spill]] %s3083_s22  ;;  %s2585_s28 = sadd.s32 4294967294, %s3107_s26  }
  0x15   : > { %3756 = sst [smem:[#allocation8_spill]] %s3087_s23  ;;  %s42_s4 = sadd.s32 1, %s3099_s25 }
  0x16   : > { %3757 = sst [smem:[#allocation9_spill]] %s3091_s24  ;;  %p43_p0 = scmp.ge.s32.totalorder %s42_s4, 2 }
  0x17   : > { %3758 = sst [smem:[#allocation10_spill]] %s3095_s2  ;;  %s45_s29 = sadd.s32 1, %s3103_s3 }
  0x18   : > { %3759 = sst [smem:[#allocation11_spill]] %s3099_s25  ;;  %p552_p1 = scmp.ne.s32.totalorder %s3087_s23, %s3083_s22 }
  0x19   : > { %3760 = sst [smem:[#allocation12_spill]] %s3103_s3  ;;  %p553_p2 = scmp.eq.s32.totalorder %s2584_s27, 3 }
  0x1a   : > { %3761 = sst [smem:[#allocation13_spill]] %s3107_s26  ;;  %s3806_s4 = smov (%p43_p0, %s42_s4), 0 }
  0x1b   : > { %3762 = sst [smem:[#allocation14_spill]] %s3806_s4  ;;  %s3808_s29 = smov (!%p43_p0, %s45_s29), %s3103_s3 }
  0x1c   : > { %p3283_p3 = por %p553_p2, %p552_p1  ;;  %p558_p4 = scmp.ne.s32.totalorder %s3083_s22, %s3079_s1 }
  0x1d   : > { %p47_p5 = scmp.ge.s32.totalorder %s3808_s29, 2  ;;  %p559_p6 = scmp.eq.s32.totalorder %s2585_s28, 3 }
  0x1e   : > { %s3763_s30 = scalar_select %p3283_p3, 1, 0 }
  0x1f   : > { %p2588_p7 = scmp.ge.s32.totalorder %s3107_s26, 1  ;;  %p690_p8 = scmp.lt.s32.totalorder %s3107_s26, 5 }
  0x20   : > { %3764 = sst [smem:[#allocation15_spill]] %s3763_s30  ;;  %s3810_s29 = smov (%p47_p5, %s3808_s29), 0 }
  0x21   : > { %3765 = sst [smem:[#allocation16_spill]] %s3810_s29  ;;  %p3293_p9 = por %p559_p6, %p558_p4 }
  0x22   : > { %p691_p10 = pnand %p2588_p7, %p690_p8  ;;  %s539_s21 = ssub.s32 %s3103_s3, %s3810_s29 }
  0x23   : > { %s3766_s0 = scalar_select %p3293_p9, 1, 0 }
  0x24   : > { %s542_s27 = sadd.s32 1, %s3087_s23  ;;  %p540_p11 = scmp.eq.s32.totalorder %s539_s21, 0 }
  0x25   : > { %3767 = sst [smem:[#allocation17_spill]] %s3766_s0  ;;  %694 = sbr.rel (%p691_p10) target bundleno = 4875 (0x130b), region = 100 }
  0x26   : > { %s3301_s4 = scalar_select %p540_p11, %s3087_s23, %s542_s27  }
  0x28   : > { %3768 = sst [smem:[#allocation18_spill]] %s3301_s4 }
  0x2a   : > { %s3729_s28 = sand.u32 1, %s3083_s22   ;;  %p796_p12 = scmp.lt.s32.totalorder %s3095_s2, 1 }
  0x2b   : > { %s3307_s25 = sshll.u32 %s3729_s28, 1  ;;  %p805_p13 = scmp.lt.s32.totalorder %s3091_s24, 1 }
  0x2c   : > { %s797_s0 = scalar_select %p796_p12, %s3095_s2, 1 }
  0x2d   : > { %s3312_s1 = scalar_select %p805_p13, %s3091_s24, 1 }
  0x2e   : > { %s2654_s21 = sshll.u32 %s797_s0, 4  ;;  %s2592_s27 = sshll.u32 %s797_s0, 1 }
  0x2f   : > { %s3769_s4 = sld [smem:[#allocation20_spill]]  ;;  %s2655_s22 = sshll.u32 %s3312_s1, 4 }
  0x30   : > { %s3770_s20 = sld [smem:[#allocation21_spill]]  ;;  %s842_s19 = scalar_lea.vmem %s3716_s13, %s3312_s1 }
  0x31   : > { %s3771_s24 = sld [smem:[#allocation24_spill]]  ;;  %s845_s16 = scalar_lea.vmem %s3717_s14, %s3312_s1 }
  0x32   : > { %s3772_s6 = sld [smem:[#allocation25_spill]]  ;;  %s795_s15 = scalar_lea.vmem [#allocation3], %s3307_s25 }
  0x33   : > { %s3774_s10 = sld [smem:[#allocation26_spill]] }
  0x34   : > { %s3776_s3 = sld [smem:[#allocation9_spill]] }
  0x35   : > { %s800_s28 = scalar_lea.vmem %s3769_s4, %s2654_s21 }
  0x36   : > { %s3320_s30 = scalar_lea.vmem %s3770_s20, %s2592_s27  ;;  %s3775_s27 = sld [smem:[#allocation27_spill]] }
  0x37   : > { %s3330_s0 = scalar_lea.vmem %s3771_s24, %s2655_s22 }
  0x38   : > { %s3335_s4 = scalar_lea.vmem %s3772_s6, %s2655_s22  ;;  %s834_s6 = scalar_lea.vmem %s3714_s11, %s3312_s1 }
  0x39   : > { %3773 = sst [smem:[#allocation19_spill]] %s3335_s4  ;;  %s3352_s24 = scalar_lea.vmem %s3774_s10, %s2655_s22 }
  0x3a   : > { %s2658_s4 = sshll.u32 %s3312_s1, 5  ;;  %p2601_p0 = scmp.ne.s32.totalorder %s3776_s3, 0 }
  0x3b   : > { %s3362_s20 = scalar_lea.vmem %s3715_s12, %s2658_s4  ;;  %s3777_s4 = sld [smem:[#allocation22_spill]] (!%p2601_p0) }
  0x3c   : > { %s848_s10 = scalar_lea.vmem %s3775_s27, %s3312_s1  ;;  %853 = sbr.rel (%p2601_p0) target bundleno = 379 (0x17b), region = 104 }
  0x3d   : > { %s3778_s23 = sld [smem:[#allocation23_spill]] (!%p2601_p0) }
  0x41   : > { %v854_v0 = vld [vmem:[%s800_s28] sm:$0xff]  ;;  %vm858_vm0 = vcmask 261120   ;;  %v855_v1 = vld [vmem:[%s800_s28 + $0x8] sm:$0xff] }
  0x42   : > { %v859_v2 = vsel %vm858_vm0, %v854_v0, 0.0  ;;  %v862_v3 = vsel %vm858_vm0, %v855_v1, 0.0  ;;  %v2602_v21 = vld [vmem:[%s3777_s4] ss:$0 sm:$0xff] }
  0x43   : > { %860 = vadd.xlane.f32.xlu0 %v859_v2  ;;  %v2603_v23 = vld [vmem:[%s3778_s23] ss:$0 sm:$0xff] }
  0x47   : > { %863 = vadd.xlane.f32.xlu0 %v862_v3 }
  0xcc   : > { %v861_v4 = vpop.xlane.xlu0 %860 }
  0xcd   : > { %v866_v5 = vmul.f32 0.03125, %v861_v4 }
  0xcf   : > { %v868_v6 = vsub.f32 %v854_v0, %v866_v5 }
  0xd0   : > { %v864_v7 = vpop.xlane.xlu0 %863 }
  0xd1   : > { %v867_v8 = vmul.f32 0.03125, %v864_v7  ;;  %v870_v9 = vmul.f32 %v868_v6, %v868_v6 }
  0xd3   : > { %v869_v10 = vsub.f32 %v855_v1, %v867_v8  ;;  %v872_v11 = vsel %vm858_vm0, %v870_v9, 0.0 }
  0xd4   : > { %873 = vadd.xlane.f32.xlu1 %v872_v11 }
  0xd5   : > { %v871_v12 = vmul.f32 %v869_v10, %v869_v10 }
  0xd7   : > { %v875_v13 = vsel %vm858_vm0, %v871_v12, 0.0 }
  0xd8   : > { %876 = vadd.xlane.f32.xlu1 %v875_v13 }
 0x15d   : > { %v874_v14 = vpop.xlane.xlu1 %873 }
 0x15e   : > { %v878_v15 = vmul.f32 0.03125, %v874_v14 }
 0x160   : > { %v880_v16 = vadd.f32 1e-12, %v878_v15 }
 0x161   : > { %v877_v17 = vpop.xlane.xlu1 %876 }
 0x162   : > { %2938 = vrsqrt.f32 %v880_v16  ;;  %v879_v18 = vmul.f32 0.03125, %v877_v17 }
 0x164   : > { %v881_v19 = vadd.f32 1e-12, %v879_v18 }
 0x166   : > { %2940 = vrsqrt.f32 %v881_v19 }
 0x16f   : > { %v2939_v20 = vpop.eup %2938 }
 0x170   : > { %v884_v22 = vmul.f32 %v2939_v20, %v868_v6 }
 0x172   : > { %v892_v24 = vmul.f32 %v2602_v21, %v884_v22 }
 0x173   : > { %v2941_v25 = vpop.eup %2940 }
 0x174   : > { %v900_v26 = vadd.f32 %v2603_v23, %v892_v24  ;;  %v885_v27 = vmul.f32 %v2941_v25, %v869_v10 }
 0x176   : > { %902 = vst.msk [vmem:[#allocation2] sm:$0xff] %vm858_vm0, %v900_v26  ;;  %v893_v28 = vmul.f32 %v2602_v21, %v885_v27 }
 0x178   : > { %v901_v29 = vadd.f32 %v2603_v23, %v893_v28 }
 0x17a   : > { %903 = vst.msk [vmem:[#allocation2 + $0x8] sm:$0xff] %vm858_vm0, %v901_v29 }
 0x17b PF: > { %v2957_v30 = vld [vmem:[%s3330_s0 + $0x8] sm:$0xff]   ;;  %v3109_v31 = vmov 0.0   ;;  %v2958_v32 = vld [vmem:[%s3330_s0] sm:$0xff]   ;;  %vm3110_vm1 = vmmov 0   ;;  %vm930_vm2 = vcmask 261120   ;;  %s3779_s21 = scalar_lea.vmem %s3708_s5, %s3312_s1  ;;  %s3111_s2 = smov 96   ;;  %v988_v51 = vlaneseq }
 0x17c   : > { %2708 = vmatprep.subr.bf16.mxu0 %v3109_v31  ;;  %2716 = vmatprep.subr.bf16.mxu1 %v3109_v31  ;;  %v2604_v36 = vld [vmem:[%s3779_s21] ss:$0 sm:$0xff]  ;;  %vm1014_vm3 = vcmask 64512   ;;  %v3112_v49 = vmov 1966171168   ;;  %s3114_s22 = smov 88  }
 0x17d   : > { %2709 = vmatpush3.bf16.msra.mxu0 %v2957_v30  ;;  %2712 = vmatprep.mubr.msk.bf16.mxu0 %vm3110_vm1, %v3109_v31  ;;  %v3396_v33 = vld [vmem:[#allocation2] sm:$0xff]  ;;  %v986_v50 = vunpack.c.l.s4 %v3112_v49  ;;  %v989_v53 = vshrl.u32 %v988_v51, 7  ;;  %vm1139_vm4 = vcmask 1043456   ;;  %s3115_s17 = smov 120   ;;  %s3116_s3 = smov 56   ;;  %vm1917_vm5 = vcmask 130048  }
 0x17e   : > { %2710 = vmatprep.subr.bf16.mxu0 %v3109_v31  ;;  %2718 = vmatprep.mubr.msk.bf16.mxu1 %vm3110_vm1, %v3109_v31  ;;  %v2608_v55 = vld.sshfl [vmem:[%s3320_s30] sm:$0x11 pattern:$0x75316420]  ;;  %s3113_s30 = smov 64   ;;  %s3117_s18 = smov 80  }
 0x17f   : > { %v987_v52 = vunpack.c.0.s8 %v986_v50  ;;  %v1001_v57 = vsub.s32 0, %v989_v53  ;;  %v984_v58 = vcombine.high %v2608_v55, %v2608_v55  ;;  %s3118_s28 = smov 112   ;;  %s3119_s4 = smov 48   ;;  %vm1920_vm6 = vcmask 195584  }
 0x180   : > { %s3120_s27 = smov 72   ;;  %s3121_s29 = smov 104   ;;  %vm2164_vm7 = vcmask 523264  }
 0x181   : > { %v3398_v34 = vld [vmem:[#allocation2 + $0x8] sm:$0xff]  ;;  %2711 = vmatpush3.bf16.msra.mxu0 %v2958_v32  ;;  %v990_v54 = vsub.s32 %v987_v52, %v989_v53  ;;  %s3122_s23 = smov 40   ;;  %s3123_s0 = smov 8  }
 0x182   : > { %v906_v35 = vpack.c.bf16 %v3398_v34, %v3396_v33  ;;  %2722 = vmatprep.subr.bf16.mxu0 %v3109_v31  ;;  %s3124_s26 = smov 16   ;;  %s3780_s21 = sld [smem:[#allocation19_spill]] }
 0x183   : > { %v991_v56 = vrot.slane %v2608_v55, %v990_v54  ;;  %v998_v60 = vrot.slane %v984_v58, %v990_v54 }
 0x184   : > { %2713 = vmatmul.mubr.msk.bf16.vlgmr.msra.gmra.mxu0 %vm930_vm2, %v906_v35 }
 0x185   : > { %2724 = vmatprep.mubr.msk.bf16.mxu0 %vm3110_vm1, %v3109_v31  ;;  %v3433_v59 = vrot.slane %v991_v56, %v1001_v57  ;;  %v3436_v63 = vrot.slane %v998_v60, %v1001_v57 }
 0x244   : > { %v968_v37 = vpop.f32.mrf.mxu0 }
 0x245   : > { %v969_v38 = vadd.f32 %v2604_v36, %v968_v37 }
 0x246   : > { %v2714_v39 = vpop.f32.mrf.mxu0 }
 0x247   : > { %v3414_v40 = vpack.c.bf16 %v969_v38, %v969_v38 }
 0x248   : > { %v971_v41 = vpop.f32.mrf.mxu0 }
 0x249   : > { %v972_v42 = vadd.f32 %v2604_v36, %v971_v41  ;;  %1012 = vrot.lane.b32.xlu0 %v3414_v40, %s3111_s2 }
 0x24a   : > { %v2715_v43 = vpop.f32.mrf.mxu0 }
 0x24b   : > { %v3417_v44 = vpack.c.bf16 %v972_v42, %v972_v42 }
 0x24d   : > { %1062 = vrot.lane.b32.xlu0 %v3417_v44, %s3111_s2  ;;  %s3125_s2 = smov 24  }
 0x2bb   : > { %v1013_v45 = vpop.permute.xlu0 %1012 }
 0x2bc   : > { %v1019_v46 = vsel %vm1014_vm3, %v1013_v45, 0 }
 0x2bd   : > { %2717 = vmatpush3.bf16.xpose.msra.mxu1 %v1019_v46 }
 0x2be   : > { %2728 = vmatprep.subr.bf16.mxu1 %v3109_v31 }
 0x2bf   : > { %v1063_v47 = vpop.permute.xlu0 %1062 }
 0x2c0   : > { %v1068_v48 = vsel %vm1014_vm3, %v1063_v47, 0 }
 0x2c1   : > { %2723 = vmatpush3.bf16.xpose.msra.mxu0 %v1068_v48 }
 0x2c2   : > { %2734 = vmatprep.subr.bf16.mxu0 %v3109_v31 }
 0x2c4   : > { %2719 = vmatmul.mubr.msk.bf16.vlgmr.msra.gmra.mxu1 %vm1014_vm3, %v3414_v40 }
 0x2c5   : > { %2730 = vmatprep.mubr.msk.bf16.mxu1 %vm3110_vm1, %v3109_v31 }
 0x2c8   : > { %2725 = vmatmul.mubr.msk.bf16.vlgmr.msra.gmra.mxu0 %vm1014_vm3, %v3417_v44 }
 0x2c9   : > { %2736 = vmatprep.mubr.msk.bf16.mxu0 %vm3110_vm1, %v3109_v31 }
 0x384   : > { %v1055_v61 = vpop.f32.mrf.mxu1 }
 0x385   : > { %v1056_v62 = vadd.f32 %v1055_v61, %v3433_v59 }
 0x386   : > { %v2720_v0 = vpop.f32.mrf.mxu1 }
 0x387   : > { %v1110_v1 = vsel %vm1014_vm3, %v1056_v62, -inf }
 0x388   : > { %1111 = vmax.xlane.f32.xlu1 %v1110_v1  ;;  %v1058_v2 = vpop.f32.mrf.mxu1  ;;  %v1104_v3 = vpop.f32.mrf.mxu0 }
 0x389   : > { %v1105_v4 = vadd.f32 %v1104_v3, %v3436_v63 }
 0x38a   : > { %v2721_v5 = vpop.f32.mrf.mxu1  ;;  %v2726_v6 = vpop.f32.mrf.mxu0 }
 0x38b   : > { %v1113_v7 = vsel %vm1014_vm3, %v1105_v4, -inf }
 0x38c   : > { %1114 = vmax.xlane.f32.xlu1 %v1113_v7  ;;  %v1107_v8 = vpop.f32.mrf.mxu0 }
 0x38e   : > { %v2727_v9 = vpop.f32.mrf.mxu0 }
 0x39d   : > { %1134 = vrot.lane.b32.xlu1 %v3414_v40, %s3113_s30 }
 0x3a1   : > { %1183 = vrot.lane.b32.xlu1 %v3417_v44, %s3113_s30  ;;  %s3785_s30 = sld [smem:[#allocation9_spill]] }
 0x3a5   : > { %1233 = vrot.lane.b32.xlu1 %v3414_v40, %s3114_s22 }
 0x3a7   : > { %p2643_p1 = scmp.ne.s32.totalorder %s3785_s30, 1 }
 0x411   : > { %v1112_v10 = vpop.xlane.xlu1 %1111 }
 0x412   : > { %v1116_v11 = vsub.f32 %v1056_v62, %v1112_v10 }
 0x414   : > { %v1118_v12 = vmul.f32 1.442695, %v1116_v11 }
 0x415   : > { %v1115_v13 = vpop.xlane.xlu1 %1114 }
 0x416   : > { %2967 = vpow2.f32 %v1118_v12  ;;  %v1117_v14 = vsub.f32 %v1105_v4, %v1115_v13 }
 0x418   : > { %v1120_v15 = vmul.f32 1.442695, %v1117_v14 }
 0x419   : > { %v1135_v16 = vpop.permute.xlu1 %1134 }
 0x41a   : > { %2969 = vpow2.f32 %v1120_v15  ;;  %v1141_v17 = vsel %vm1139_vm4, %v1135_v16, 0 }
 0x41b   : > { %2729 = vmatpush3.bf16.msra.mxu1 %v1141_v17 }
 0x41c   : > { %2740 = vmatprep.subr.bf16.mxu1 %v3109_v31 }
 0x41d   : > { %v1184_v18 = vpop.permute.xlu1 %1183 }
 0x41e   : > { %v1189_v19 = vsel %vm1139_vm4, %v1184_v18, 0 }
 0x41f   : > { %2735 = vmatpush3.bf16.msra.mxu0 %v1189_v19 }
 0x420   : > { %2746 = vmatprep.subr.bf16.mxu0 %v3109_v31 }
 0x421   : > { %v1234_v24 = vpop.permute.xlu1 %1233 }
 0x422   : > { %v1239_v32 = vsel %vm1014_vm3, %v1234_v24, 0 }
 0x423   : > { %v2968_v20 = vpop.eup %2967 }
 0x424   : > { %v1122_v21 = vsel %vm1014_vm3, %v2968_v20, 0.0 }
 0x425   : > { %1123 = vadd.xlane.f32.xlu0 %v1122_v21 }
 0x427   : > { %v2970_v22 = vpop.eup %2969 }
 0x428   : > { %v1125_v23 = vsel %vm1014_vm3, %v2970_v22, 0.0 }
 0x429   : > { %1126 = vadd.xlane.f32.xlu1 %v1125_v23 }
 0x43a   : > { %1283 = vrot.lane.b32.xlu1 %v3417_v44, %s3114_s22 }
 0x43b   : > { %1231 = vrot.lane.b32.xlu0 %v3414_v40, %s3115_s17 }
 0x43e   : > { %1281 = vrot.lane.b32.xlu1 %v3417_v44, %s3115_s17  ;;  %s3781_s17 = scalar_lea.vmem %s3710_s7, %s3312_s1 }
 0x4ae   : > { %v1124_v25 = vpop.xlane.xlu0 %1123 }
 0x4af   : > { %2971 = vrcp.f32 %v1124_v25 }
 0x4b2   : > { %v1127_v26 = vpop.xlane.xlu1 %1126  ;;  %v1232_v39 = vpop.permute.xlu0 %1231 }
 0x4b3   : > { %2973 = vrcp.f32 %v1127_v26 }
 0x4b6   : > { %v1284_v36 = vpop.permute.xlu1 %1283 }
 0x4b7   : > { %v1289_v38 = vsel %vm1014_vm3, %v1284_v36, 0 }
 0x4ba   : > { %v1282_v41 = vpop.permute.xlu1 %1281 }
 0x4bc   : > { %v2972_v27 = vpop.eup %2971 }
 0x4bd   : > { %v1130_v28 = vmul.f32 %v2972_v27, %v2968_v20 }
 0x4bf   : > { %v1132_v29 = vpack.c.bf16 %v1130_v28, %v1130_v28 }
 0x4c0   : > { %v2974_v30 = vpop.eup %2973 }
 0x4c1   : > { %2731 = vmatmul.mubr.msk.bf16.vlgmr.msra.gmra.mxu1 %vm1014_vm3, %v1132_v29  ;;  %v1131_v35 = vmul.f32 %v2974_v30, %v2970_v22 }
 0x4c2   : > { %2741 = vmatpush3.bf16.xpose.msra.mxu1 %v1239_v32  ;;  %2742 = vmatprep.mubr.msk.bf16.mxu1 %vm3110_vm1, %v3109_v31 }
 0x4c3   : > { %v1133_v37 = vpack.c.bf16 %v1131_v35, %v1131_v35  ;;  %2752 = vmatprep.subr.bf16.mxu1 %v3109_v31 }
 0x4c5   : > { %2737 = vmatmul.mubr.msk.bf16.vlgmr.msra.gmra.mxu0 %vm1014_vm3, %v1133_v37 }
 0x4c6   : > { %2747 = vmatpush3.bf16.xpose.msra.mxu0 %v1289_v38  ;;  %2748 = vmatprep.mubr.msk.bf16.mxu0 %vm3110_vm1, %v3109_v31 }
 0x4c7   : > { %2758 = vmatprep.subr.bf16.mxu0 %v3109_v31 }
 0x4c9   : > { %2743 = vmatmul.mubr.msk.bf16.vlgmr.msra.gmra.mxu1 %vm1014_vm3, %v1232_v39 }
 0x4ca   : > { %2754 = vmatprep.mubr.msk.bf16.mxu1 %vm3110_vm1, %v3109_v31 }
 0x4cd   : > { %2749 = vmatmul.mubr.msk.bf16.vlgmr.msra.gmra.mxu0 %vm1014_vm3, %v1282_v41 }
 0x4ce   : > { %2760 = vmatprep.mubr.msk.bf16.mxu0 %vm3110_vm1, %v3109_v31 }
 0x581   : > { %v3469_v42 = vpop.f32.mrf.mxu1 }
 0x583   : > { %v2732_v43 = vpop.f32.mrf.mxu1 }
 0x585   : > { %v1180_v45 = vpop.f32.mrf.mxu1  ;;  %v3471_v46 = vpop.f32.mrf.mxu0 }
 0x587   : > { %v2733_v47 = vpop.f32.mrf.mxu1  ;;  %v2738_v48 = vpop.f32.mrf.mxu0 }
 0x589   : > { %v1228_v49 = vpop.f32.mrf.mxu0  ;;  %v1275_v50 = vpop.f32.mrf.mxu1 }
 0x58a   : > { %v1276_v51 = vadd.f32 %v1275_v50, %v3433_v59 }
 0x58b   : > { %v2739_v52 = vpop.f32.mrf.mxu0  ;;  %v2744_v53 = vpop.f32.mrf.mxu1 }
 0x58c   : > { %v1331_v54 = vsel %vm1014_vm3, %v1276_v51, -inf }
 0x58d   : > { %1332 = vmax.xlane.f32.xlu1 %v1331_v54  ;;  %v1278_v55 = vpop.f32.mrf.mxu1  ;;  %v1325_v56 = vpop.f32.mrf.mxu0 }
 0x58e   : > { %v1326_v57 = vadd.f32 %v1325_v56, %v3436_v63 }
 0x58f   : > { %v2745_v58 = vpop.f32.mrf.mxu1  ;;  %v2750_v60 = vpop.f32.mrf.mxu0 }
 0x590   : > { %v1334_v61 = vsel %vm1014_vm3, %v1326_v57, -inf }
 0x591   : > { %1335 = vmax.xlane.f32.xlu0 %v1334_v61  ;;  %v1328_v62 = vpop.f32.mrf.mxu0 }
 0x593   : > { %v2751_v0 = vpop.f32.mrf.mxu0 }
 0x59e   : > { %1355 = vrot.lane.b32.xlu1 %v3414_v40, %s3116_s3 }
 0x5a2   : > { %1453 = vrot.lane.b32.xlu1 %v3414_v40, %s3117_s18 }
 0x5a7   : > { %1403 = vrot.lane.b32.xlu0 %v3417_v44, %s3116_s3 }
 0x5ab   : > { %1451 = vrot.lane.b32.xlu0 %v3414_v40, %s3118_s28 }
 0x616   : > { %v1333_v1 = vpop.xlane.xlu1 %1332 }
 0x617   : > { %v1337_v2 = vsub.f32 %v1276_v51, %v1333_v1 }
 0x619   : > { %v1339_v3 = vmul.f32 1.442695, %v1337_v2 }
 0x61a   : > { %v1356_v4 = vpop.permute.xlu1 %1355  ;;  %v1336_v5 = vpop.xlane.xlu0 %1335 }
 0x61b   : > { %2975 = vpow2.f32 %v1339_v3  ;;  %v1361_v6 = vsel %vm1139_vm4, %v1356_v4, 0  ;;  %v1338_v7 = vsub.f32 %v1326_v57, %v1336_v5 }
 0x61c   : > { %2753 = vmatpush3.bf16.msra.mxu1 %v1361_v6 }
 0x61d   : > { %v1341_v8 = vmul.f32 1.442695, %v1338_v7  ;;  %2764 = vmatprep.subr.bf16.mxu1 %v3109_v31 }
 0x61e   : > { %v1404_v9 = vpop.permute.xlu0 %1403  ;;  %v1454_v15 = vpop.permute.xlu1 %1453 }
 0x61f   : > { %2977 = vpow2.f32 %v1341_v8  ;;  %v1409_v10 = vsel %vm1139_vm4, %v1404_v9, 0  ;;  %v1459_v22 = vsel %vm1014_vm3, %v1454_v15, 0 }
 0x620   : > { %2759 = vmatpush3.bf16.msra.mxu0 %v1409_v10 }
 0x621   : > { %2770 = vmatprep.subr.bf16.mxu0 %v3109_v31 }
 0x622   : > { %v1452_v27 = vpop.permute.xlu0 %1451 }
 0x628   : > { %v2976_v11 = vpop.eup %2975 }
 0x629   : > { %v1343_v12 = vsel %vm1014_vm3, %v2976_v11, 0.0 }
 0x62a   : > { %1344 = vadd.xlane.f32.xlu1 %v1343_v12 }
 0x62c   : > { %v2978_v13 = vpop.eup %2977 }
 0x62d   : > { %v1346_v14 = vsel %vm1014_vm3, %v2978_v13, 0.0 }
 0x62e   : > { %1347 = vadd.xlane.f32.xlu1 %v1346_v14 }
 0x63f   : > { %1503 = vrot.lane.b32.xlu1 %v3417_v44, %s3117_s18 }
 0x643   : > { %1501 = vrot.lane.b32.xlu1 %v3417_v44, %s3118_s28 }
 0x6b3   : > { %v1345_v16 = vpop.xlane.xlu1 %1344 }
 0x6b4   : > { %2979 = vrcp.f32 %v1345_v16 }
 0x6b7   : > { %v1348_v17 = vpop.xlane.xlu1 %1347 }
 0x6b8   : > { %2981 = vrcp.f32 %v1348_v17 }
 0x6bb   : > { %v1504_v24 = vpop.permute.xlu1 %1503 }
 0x6bc   : > { %v1509_v26 = vsel %vm1014_vm3, %v1504_v24, 0 }
 0x6bf   : > { %v1502_v28 = vpop.permute.xlu1 %1501 }
 0x6c1   : > { %v2980_v18 = vpop.eup %2979 }
 0x6c2   : > { %v1351_v19 = vmul.f32 %v2980_v18, %v2976_v11 }
 0x6c4   : > { %v1353_v20 = vpack.c.bf16 %v1351_v19, %v1351_v19 }
 0x6c5   : > { %v2982_v21 = vpop.eup %2981 }
 0x6c6   : > { %2755 = vmatmul.mubr.msk.bf16.vlgmr.msra.gmra.mxu1 %vm1014_vm3, %v1353_v20  ;;  %v1352_v23 = vmul.f32 %v2982_v21, %v2978_v13 }
 0x6c7   : > { %2765 = vmatpush3.bf16.xpose.msra.mxu1 %v1459_v22  ;;  %2766 = vmatprep.mubr.msk.bf16.mxu1 %vm3110_vm1, %v3109_v31 }
 0x6c8   : > { %v1354_v25 = vpack.c.bf16 %v1352_v23, %v1352_v23  ;;  %2776 = vmatprep.subr.bf16.mxu1 %v3109_v31 }
 0x6ca   : > { %2761 = vmatmul.mubr.msk.bf16.vlgmr.msra.gmra.mxu0 %vm1014_vm3, %v1354_v25 }
 0x6cb   : > { %2771 = vmatpush3.bf16.xpose.msra.mxu0 %v1509_v26  ;;  %2772 = vmatprep.mubr.msk.bf16.mxu0 %vm3110_vm1, %v3109_v31 }
 0x6cc   : > { %2782 = vmatprep.subr.bf16.mxu0 %v3109_v31 }
 0x6ce   : > { %2767 = vmatmul.mubr.msk.bf16.vlgmr.msra.gmra.mxu1 %vm1014_vm3, %v1452_v27 }
 0x6cf   : > { %2778 = vmatprep.mubr.msk.bf16.mxu1 %vm3110_vm1, %v3109_v31 }
 0x6d2   : > { %2773 = vmatmul.mubr.msk.bf16.vlgmr.msra.gmra.mxu0 %vm1014_vm3, %v1502_v28 }
 0x6d3   : > { %2784 = vmatprep.mubr.msk.bf16.mxu0 %vm3110_vm1, %v3109_v31 }
 0x786   : > { %v3505_v29 = vpop.f32.mrf.mxu1 }
 0x788   : > { %v2756_v30 = vpop.f32.mrf.mxu1 }
 0x78a   : > { %v1400_v32 = vpop.f32.mrf.mxu1  ;;  %v3507_v35 = vpop.f32.mrf.mxu0 }
 0x78b   : > { %v2942_v36 = vpack.i.bf16 %v3507_v35, %v3505_v29 }
 0x78c   : > { %v2757_v37 = vpop.f32.mrf.mxu1  ;;  %v2762_v38 = vpop.f32.mrf.mxu0 }
 0x78e   : > { %v1448_v39 = vpop.f32.mrf.mxu0  ;;  %v1495_v41 = vpop.f32.mrf.mxu1 }
 0x78f   : > { %v1496_v43 = vadd.f32 %v1495_v41, %v3433_v59 }
 0x790   : > { %v2763_v45 = vpop.f32.mrf.mxu0  ;;  %v2768_v47 = vpop.f32.mrf.mxu1 }
 0x791   : > { %v1551_v48 = vsel %vm1014_vm3, %v1496_v43, -inf }
 0x792   : > { %1552 = vmax.xlane.f32.xlu0 %v1551_v48  ;;  %v1498_v49 = vpop.f32.mrf.mxu1  ;;  %v1545_v50 = vpop.f32.mrf.mxu0 }
 0x793   : > { %v1546_v51 = vadd.f32 %v1545_v50, %v3436_v63 }
 0x794   : > { %v2769_v52 = vpop.f32.mrf.mxu1  ;;  %v2774_v53 = vpop.f32.mrf.mxu0 }
 0x795   : > { %v1554_v54 = vsel %vm1014_vm3, %v1546_v51, -inf }
 0x796   : > { %1555 = vmax.xlane.f32.xlu1 %v1554_v54  ;;  %v1548_v55 = vpop.f32.mrf.mxu0 }
 0x798   : > { %v2775_v56 = vpop.f32.mrf.mxu0 }
 0x7a7   : > { %1575 = vrot.lane.b32.xlu1 %v3414_v40, %s3119_s4 }
 0x7ab   : > { %1673 = vrot.lane.b32.xlu1 %v3414_v40, %s3120_s27 }
 0x7af   : > { %1723 = vrot.lane.b32.xlu1 %v3417_v44, %s3120_s27  ;;  %s3783_s27 = scalar_lea.vmem %s3712_s9, %s3312_s1 }
 0x7b3   : > { %1721 = vrot.lane.b32.xlu1 %v3417_v44, %s3121_s29 }
 0x81b   : > { %v1553_v57 = vpop.xlane.xlu0 %1552 }
 0x81c   : > { %v1557_v58 = vsub.f32 %v1496_v43, %v1553_v57 }
 0x81e   : > { %v1559_v60 = vmul.f32 1.442695, %v1557_v58 }
 0x81f   : > { %v1556_v61 = vpop.xlane.xlu1 %1555 }
 0x820   : > { %2983 = vpow2.f32 %v1559_v60  ;;  %v1558_v62 = vsub.f32 %v1546_v51, %v1556_v61 }
 0x822   : > { %v1561_v0 = vmul.f32 1.442695, %v1558_v62 }
 0x823   : > { %v1576_v1 = vpop.permute.xlu1 %1575 }
 0x824   : > { %2985 = vpow2.f32 %v1561_v0  ;;  %v1581_v2 = vsel %vm1139_vm4, %v1576_v1, 0 }
 0x825   : > { %2777 = vmatpush3.bf16.msra.mxu1 %v1581_v2 }
 0x826   : > { %2788 = vmatprep.subr.bf16.mxu1 %v3109_v31 }
 0x827   : > { %v1674_v12 = vpop.permute.xlu1 %1673 }
 0x828   : > { %v1679_v16 = vsel %vm1014_vm3, %v1674_v12, 0 }
 0x82b   : > { %v1724_v18 = vpop.permute.xlu1 %1723 }
 0x82c   : > { %v1729_v20 = vsel %vm1014_vm3, %v1724_v18, 0 }
 0x82d   : > { %v2984_v3 = vpop.eup %2983 }
 0x82e   : > { %v1563_v4 = vsel %vm1014_vm3, %v2984_v3, 0.0 }
 0x82f   : > { %1564 = vadd.xlane.f32.xlu0 %v1563_v4  ;;  %v1722_v22 = vpop.permute.xlu1 %1721 }
 0x831   : > { %v2986_v5 = vpop.eup %2985 }
 0x832   : > { %v1566_v6 = vsel %vm1014_vm3, %v2986_v5, 0.0 }
 0x833   : > { %1567 = vadd.xlane.f32.xlu0 %v1566_v6 }
 0x849   : > { %1623 = vrot.lane.b32.xlu0 %v3417_v44, %s3119_s4 }
 0x84d   : > { %1671 = vrot.lane.b32.xlu0 %v3414_v40, %s3121_s29 }
 0x8b8   : > { %v1565_v7 = vpop.xlane.xlu0 %1564 }
 0x8b9   : > { %2987 = vrcp.f32 %v1565_v7  ;;  %v2959_v7 = vld [vmem:[%s3780_s21 + $0x8] sm:$0xff]  }
 0x8bc   : > { %v1568_v8 = vpop.xlane.xlu0 %1567 }
 0x8bd   : > { %2989 = vrcp.f32 %v1568_v8  ;;  %v2960_v8 = vld [vmem:[%s3780_s21] sm:$0xff]  }
 0x8c0   : > { %v1624_v9 = vpop.permute.xlu0 %1623 }
 0x8c1   : > { %v1629_v10 = vsel %vm1139_vm4, %v1624_v9, 0 }
 0x8c2   : > { %2783 = vmatpush3.bf16.msra.mxu0 %v1629_v10 }
 0x8c3   : > { %2794 = vmatprep.subr.bf16.mxu0 %v3109_v31 }
 0x8c4   : > { %v1672_v21 = vpop.permute.xlu0 %1671 }
 0x8c6   : > { %v2988_v11 = vpop.eup %2987 }
 0x8c7   : > { %v1571_v13 = vmul.f32 %v2988_v11, %v2984_v3 }
 0x8c9   : > { %v1573_v14 = vpack.c.bf16 %v1571_v13, %v1571_v13 }
 0x8ca   : > { %v2990_v15 = vpop.eup %2989 }
 0x8cb   : > { %2779 = vmatmul.mubr.msk.bf16.vlgmr.msra.gmra.mxu1 %vm1014_vm3, %v1573_v14  ;;  %v1572_v17 = vmul.f32 %v2990_v15, %v2986_v5 }
 0x8cc   : > { %2789 = vmatpush3.bf16.xpose.msra.mxu1 %v1679_v16  ;;  %2790 = vmatprep.mubr.msk.bf16.mxu1 %vm3110_vm1, %v3109_v31 }
 0x8cd   : > { %v1574_v19 = vpack.c.bf16 %v1572_v17, %v1572_v17  ;;  %2800 = vmatprep.subr.bf16.mxu1 %v3109_v31 }
 0x8cf   : > { %2785 = vmatmul.mubr.msk.bf16.vlgmr.msra.gmra.mxu0 %vm1014_vm3, %v1574_v19 }
 0x8d0   : > { %2795 = vmatpush3.bf16.xpose.msra.mxu0 %v1729_v20  ;;  %2796 = vmatprep.mubr.msk.bf16.mxu0 %vm3110_vm1, %v3109_v31 }
 0x8d1   : > { %2806 = vmatprep.subr.bf16.mxu0 %v3109_v31 }
 0x8d3   : > { %2791 = vmatmul.mubr.msk.bf16.vlgmr.msra.gmra.mxu1 %vm1014_vm3, %v1672_v21 }
 0x8d4   : > { %2802 = vmatprep.mubr.msk.bf16.mxu1 %vm3110_vm1, %v3109_v31 }
 0x8d7   : > { %2797 = vmatmul.mubr.msk.bf16.vlgmr.msra.gmra.mxu0 %vm1014_vm3, %v1722_v22 }
 0x8d8   : > { %2808 = vmatprep.mubr.msk.bf16.mxu0 %vm3110_vm1, %v3109_v31 }
 0x98b   : > { %v1617_v23 = vpop.f32.mrf.mxu1 }
 0x98d   : > { %v2780_v24 = vpop.f32.mrf.mxu1 }
 0x98f   : > { %v1620_v25 = vpop.f32.mrf.mxu1  ;;  %v1665_v26 = vpop.f32.mrf.mxu0 }
 0x991   : > { %v2781_v27 = vpop.f32.mrf.mxu1  ;;  %v2786_v28 = vpop.f32.mrf.mxu0 }
 0x993   : > { %v1668_v30 = vpop.f32.mrf.mxu0  ;;  %v1715_v32 = vpop.f32.mrf.mxu1 }
 0x994   : > { %v1716_v37 = vadd.f32 %v1715_v32, %v3433_v59  ;;  %v2947_v59 = vpack.i.bf16 %v1665_v26, %v1617_v23 }
 0x995   : > { %v2787_v38 = vpop.f32.mrf.mxu0  ;;  %v2792_v39 = vpop.f32.mrf.mxu1 }
 0x996   : > { %v1771_v41 = vsel %vm1014_vm3, %v1716_v37, -inf }
 0x997   : > { %1772 = vmax.xlane.f32.xlu0 %v1771_v41  ;;  %v1718_v43 = vpop.f32.mrf.mxu1  ;;  %v1765_v45 = vpop.f32.mrf.mxu0 }
 0x998   : > { %v1766_v47 = vadd.f32 %v1765_v45, %v3436_v63 }
 0x999   : > { %v2793_v48 = vpop.f32.mrf.mxu1  ;;  %v2798_v49 = vpop.f32.mrf.mxu0 }
 0x99a   : > { %v1774_v50 = vsel %vm1014_vm3, %v1766_v47, -inf }
 0x99b   : > { %1775 = vmax.xlane.f32.xlu1 %v1774_v50  ;;  %v1768_v51 = vpop.f32.mrf.mxu0 }
 0x99d   : > { %v2799_v52 = vpop.f32.mrf.mxu0 }
 0x9ac   : > { %1795 = vrot.lane.b32.xlu1 %v3414_v40, %s3122_s23 }
 0x9b0   : > { %2943 = vrot.lane.b32.xlu1 %v2942_v36, %s3123_s0 }
 0x9b4   : > { %2948 = vrot.lane.b32.xlu1 %v2947_v59, %s3124_s26 }
 0xa20   : > { %v1773_v53 = vpop.xlane.xlu0 %1772 }
 0xa21   : > { %v1777_v63 = vsub.f32 %v1716_v37, %v1773_v53 }
 0xa23   : > { %v1779_v54 = vmul.f32 1.442695, %v1777_v63 }
 0xa24   : > { %v1776_v55 = vpop.xlane.xlu1 %1775 }
 0xa25   : > { %2991 = vpow2.f32 %v1779_v54  ;;  %v1778_v56 = vsub.f32 %v1766_v47, %v1776_v55 }
 0xa27   : > { %v1781_v57 = vmul.f32 1.442695, %v1778_v56 }
 0xa28   : > { %v1796_v58 = vpop.permute.xlu1 %1795 }
 0xa29   : > { %2993 = vpow2.f32 %v1781_v57  ;;  %v1801_v60 = vsel %vm1139_vm4, %v1796_v58, 0 }
 0xa2a   : > { %2801 = vmatpush3.bf16.msra.mxu1 %v1801_v60 }
 0xa2b   : > { %2812 = vmatprep.subr.bf16.mxu1 %v3109_v31 }
 0xa2c   : > { %v2944_v18 = vpop.permute.xlu1 %2943 }
 0xa2d   : > { %v2946_v20 = vunpack.i.h.bf16 %v2944_v18  ;;  %v2945_v21 = vunpack.i.l.bf16 %v2944_v18 }
 0xa2f   : > { %v1916_v25 = vsel %vm1014_vm3, %v3471_v46, %v2946_v20  ;;  %v1915_v26 = vsel %vm1014_vm3, %v3469_v42, %v2945_v21  ;;  %v2625_v46 = vld [vmem:[%s3781_s17] ss:$0 sm:$0xff]  ;;  %s3786_s17 = sld [smem:[#allocation28_spill]] (!%p2643_p1) }
 0xa30   : > { %v2949_v19 = vpop.permute.xlu1 %2948 }
 0xa31   : > { %v2951_v22 = vunpack.i.h.bf16 %v2949_v19  ;;  %v2950_v23 = vunpack.i.l.bf16 %v2949_v19 }
 0xa32   : > { %v2992_v40 = vpop.eup %2991 }
 0xa33   : > { %v1783_v29 = vsel %vm1014_vm3, %v2992_v40, 0.0  ;;  %v1918_v30 = vsel %vm1917_vm5, %v1915_v26, %v2950_v23  ;;  %v1919_v32 = vsel %vm1917_vm5, %v1916_v25, %v2951_v22 }
 0xa34   : > { %1784 = vadd.xlane.f32.xlu0 %v1783_v29 }
 0xa36   : > { %v2994_v35 = vpop.eup %2993 }
 0xa37   : > { %v1786_v36 = vsel %vm1014_vm3, %v2994_v35, 0.0 }
 0xa38   : > { %1787 = vadd.xlane.f32.xlu0 %v1786_v36 }
 0xa4e   : > { %1843 = vrot.lane.b32.xlu0 %v3417_v44, %s3122_s23 }
 0xabd   : > { %v1785_v61 = vpop.xlane.xlu0 %1784 }
 0xabe   : > { %2995 = vrcp.f32 %v1785_v61 }
 0xac1   : > { %v1788_v62 = vpop.xlane.xlu0 %1787 }
 0xac2   : > { %2997 = vrcp.f32 %v1788_v62 }
 0xac5   : > { %v1844_v0 = vpop.permute.xlu0 %1843 }
 0xac6   : > { %v1849_v1 = vsel %vm1139_vm4, %v1844_v0, 0 }
 0xac7   : > { %2807 = vmatpush3.bf16.msra.mxu0 %v1849_v1 }
 0xac8   : > { %2820 = vmatprep.subr.bf16.mxu0 %v3109_v31 }
 0xacb   : > { %v2996_v2 = vpop.eup %2995 }
 0xacc   : > { %v1791_v3 = vmul.f32 %v2996_v2, %v2992_v40  ;;  %v2962_v40 = vld [vmem:[%s3352_s24] sm:$0xff]  }
 0xace   : > { %v1793_v4 = vpack.c.bf16 %v1791_v3, %v1791_v3 }
 0xacf   : > { %v2998_v5 = vpop.eup %2997 }
 0xad0   : > { %2803 = vmatmul.mubr.msk.bf16.vlgmr.msra.gmra.mxu1 %vm1014_vm3, %v1793_v4  ;;  %v1792_v6 = vmul.f32 %v2998_v5, %v2994_v35 }
 0xad1   : > { %2816 = vmatprep.mubr.msk.bf16.mxu1 %vm3110_vm1, %v3109_v31  ;;  %2813 = vmatpush3.bf16.msra.mxu1 %v2959_v7 }
 0xad2   : > { %v1794_v44 = vpack.c.bf16 %v1792_v6, %v1792_v6  ;;  %2814 = vmatprep.subr.bf16.mxu1 %v3109_v31 }
 0xad4   : > { %2809 = vmatmul.mubr.msk.bf16.vlgmr.msra.gmra.mxu0 %vm1014_vm3, %v1794_v44  ;;  %v2630_v44 = vld [vmem:[%s3783_s27] ss:$0 sm:$0xff]  ;;  %s3788_s27 = sld [smem:[#allocation30_spill]] (!%p2643_p1) }
 0xad5   : > { %2824 = vmatprep.mubr.msk.bf16.mxu0 %vm3110_vm1, %v3109_v31  ;;  %2815 = vmatpush3.bf16.msra.mxu1 %v2960_v8 }
 0xad6   : > { %2828 = vmatprep.subr.bf16.mxu1 %v3109_v31 }
 0xb90   : > { %v1837_v9 = vpop.f32.mrf.mxu1 }
 0xb92   : > { %v2804_v10 = vpop.f32.mrf.mxu1 }
 0xb94   : > { %v1840_v11 = vpop.f32.mrf.mxu1  ;;  %v1885_v12 = vpop.f32.mrf.mxu0 }
 0xb95   : > { %v2952_v13 = vpack.i.bf16 %v1885_v12, %v1837_v9  ;;  %v2963_v11 = vld [vmem:[%s3362_s20 + $0x18] sm:$0xff]   ;;  %v2964_v12 = vld [vmem:[%s3362_s20 + $0x10] sm:$0xff]  }
 0xb96   : > { %v2805_v14 = vpop.f32.mrf.mxu1  ;;  %v2810_v15 = vpop.f32.mrf.mxu0 }
 0xb97   : > { %2953 = vrot.lane.b32.xlu0 %v2952_v13, %s3125_s2  ;;  %v2965_v13 = vld [vmem:[%s3362_s20 + $0x8] sm:$0xff]   ;;  %v2966_v14 = vld [vmem:[%s3362_s20] sm:$0xff]  }
 0xb98   : > { %v1888_v16 = vpop.f32.mrf.mxu0  ;;  %v2631_v15 = vld [vmem:[%s834_s6] ss:$0 sm:$0xff]  ;;  %s3789_s6 = sld [smem:[#allocation31_spill]] (!%p2643_p1) }
 0xb9a   : > { %v2811_v17 = vpop.f32.mrf.mxu0 }
 0xc09   : > { %v2954_v24 = vpop.permute.xlu0 %2953 }
 0xc0a   : > { %v2956_v27 = vunpack.i.h.bf16 %v2954_v24  ;;  %v2955_v28 = vunpack.i.l.bf16 %v2954_v24 }
 0xc0c   : > { %v1922_v37 = vsel %vm1920_vm6, %v1919_v32, %v2956_v27  ;;  %v1921_v38 = vsel %vm1920_vm6, %v1918_v30, %v2955_v28 }
 0xc0d   : > { %v1923_v39 = vpack.c.bf16 %v1922_v37, %v1921_v38 }
 0xc0f   : > { %2817 = vmatmul.mubr.msk.bf16.vlgmr.msra.gmra.mxu1 %vm930_vm2, %v1923_v39 }
 0xc10   : > { %2836 = vmatprep.mubr.msk.bf16.mxu1 %vm3110_vm1, %v3109_v31  ;;  %2829 = vmatpush3.bf16.msra.mxu1 %v2963_v11 }
 0xc11   : > { %2830 = vmatprep.subr.bf16.mxu1 %v3109_v31 }
 0xc14   : > { %2831 = vmatpush3.bf16.msra.mxu1 %v2964_v12 }
 0xc15   : > { %2832 = vmatprep.subr.bf16.mxu1 %v3109_v31 }
 0xc18   : > { %2833 = vmatpush3.bf16.msra.mxu1 %v2965_v13 }
 0xc19   : > { %2834 = vmatprep.subr.bf16.mxu1 %v3109_v31 }
 0xc1c   : > { %2835 = vmatpush3.bf16.msra.mxu1 %v2966_v14 }
 0xccf   : > { %v1984_v41 = vpop.f32.mrf.mxu1 }
 0xcd0   : > { %v1985_v43 = vadd.f32 %v2625_v46, %v1984_v41 }
 0xcd1   : > { %v2818_v42 = vpop.f32.mrf.mxu1 }
 0xcd2   : > { %v1991_v45 = vadd.f32 %v1985_v43, %v3396_v33 }
 0xcd3   : > { %v1987_v47 = vpop.f32.mrf.mxu1 }
 0xcd4   : > { %v1988_v48 = vadd.f32 %v2625_v46, %v1987_v47  ;;  %v1995_v49 = vsel %vm930_vm2, %v1991_v45, 0.0 }
 0xcd5   : > { %1996 = vadd.xlane.f32.xlu1 %v1995_v49  ;;  %v2819_v50 = vpop.f32.mrf.mxu1 }
 0xcd6   : > { %v1992_v51 = vadd.f32 %v1988_v48, %v3398_v34  ;;  %v2961_v34 = vld [vmem:[%s3352_s24 + $0x8] sm:$0xff]   ;;  %s3782_s24 = scalar_lea.vmem %s3711_s8, %s3312_s1  ;;  %v2635_v48 = vld [vmem:[%s842_s19] ss:$0 sm:$0xff] }
 0xcd7   : > { %2821 = vmatpush3.bf16.msra.mxu0 %v2961_v34  ;;  %v2629_v3 = vld [vmem:[%s3782_s24] ss:$0 sm:$0xff]  ;;  %s3787_s24 = sld [smem:[#allocation29_spill]] (!%p2643_p1) }
 0xcd8   : > { %v1998_v52 = vsel %vm930_vm2, %v1992_v51, 0.0  ;;  %2822 = vmatprep.subr.bf16.mxu0 %v3109_v31 }
 0xcd9   : > { %1999 = vadd.xlane.f32.xlu0 %v1998_v52 }
 0xcdb   : > { %2823 = vmatpush3.bf16.msra.mxu0 %v2962_v40 }
 0xd5e   : > { %v1997_v59 = vpop.xlane.xlu1 %1996 }
 0xd5f   : > { %v2002_v53 = vmul.f32 0.03125, %v1997_v59 }
 0xd61   : > { %v2004_v63 = vsub.f32 %v1991_v45, %v2002_v53 }
 0xd62   : > { %v2000_v54 = vpop.xlane.xlu0 %1999 }
 0xd63   : > { %v2003_v55 = vmul.f32 0.03125, %v2000_v54  ;;  %v2006_v56 = vmul.f32 %v2004_v63, %v2004_v63 }
 0xd65   : > { %v2005_v33 = vsub.f32 %v1992_v51, %v2003_v55  ;;  %v2008_v57 = vsel %vm930_vm2, %v2006_v56, 0.0 }
 0xd66   : > { %2009 = vadd.xlane.f32.xlu0 %v2008_v57 }
 0xd67   : > { %v2007_v58 = vmul.f32 %v2005_v33, %v2005_v33 }
 0xd69   : > { %v2011_v60 = vsel %vm930_vm2, %v2007_v58, 0.0 }
 0xd6a   : > { %2012 = vadd.xlane.f32.xlu1 %v2011_v60 }
 0xdef   : > { %v2010_v29 = vpop.xlane.xlu0 %2009 }
 0xdf0   : > { %v2014_v35 = vmul.f32 0.03125, %v2010_v29 }
 0xdf2   : > { %v2016_v36 = vadd.f32 1e-12, %v2014_v35 }
 0xdf3   : > { %v2013_v61 = vpop.xlane.xlu1 %2012 }
 0xdf4   : > { %2999 = vrsqrt.f32 %v2016_v36  ;;  %v2015_v62 = vmul.f32 0.03125, %v2013_v61 }
 0xdf6   : > { %v2017_v0 = vadd.f32 1e-12, %v2015_v62 }
 0xdf8   : > { %3001 = vrsqrt.f32 %v2017_v0 }
 0xe01   : > { %v3000_v1 = vpop.eup %2999 }
 0xe02   : > { %v2020_v2 = vmul.f32 %v3000_v1, %v2004_v63 }
 0xe04   : > { %v2028_v6 = vmul.f32 %v2629_v3, %v2020_v2 }
 0xe05   : > { %v3002_v4 = vpop.eup %3001 }
 0xe06   : > { %v2021_v5 = vmul.f32 %v3002_v4, %v2005_v33  ;;  %v2036_v8 = vadd.f32 %v2630_v44, %v2028_v6  ;;  %v2641_v6 = vld [vmem:[%s845_s16] ss:$0 sm:$0xff] }
 0xe08   : > { %v2029_v7 = vmul.f32 %v2629_v3, %v2021_v5 }
 0xe0a   : > { %v2037_v9 = vadd.f32 %v2630_v44, %v2029_v7  ;;  %v2642_v7 = vld [vmem:[%s848_s10] ss:$0 sm:$0xff] }
 0xe0c   : > { %v2038_v10 = vpack.c.bf16 %v2037_v9, %v2036_v8 }
 0xe0e   : > { %2825 = vmatmul.mubr.msk.bf16.vlgmr.msra.gmra.mxu0 %vm930_vm2, %v2038_v10 }
 0xece   : > { %v2099_v16 = vpop.f32.mrf.mxu0 }
 0xecf   : > { %v2100_v17 = vadd.f32 %v2631_v15, %v2099_v16 }
 0xed0   : > { %v2826_v18 = vpop.f32.mrf.mxu0 }
 0xed1   : > { %v2108_v19 = vmul.f32 0.044715, %v2100_v17  ;;  %v2106_v46 = vmul.f32 0.5, %v2100_v17 }
 0xed2   : > { %v2102_v20 = vpop.f32.mrf.mxu0 }
 0xed3   : > { %v2110_v21 = vmul.f32 %v2108_v19, %v2100_v17  ;;  %v2103_v22 = vadd.f32 %v2631_v15, %v2102_v20 }
 0xed4   : > { %v2827_v23 = vpop.f32.mrf.mxu0 }
 0xed5   : > { %v2112_v24 = vmul.f32 %v2110_v21, %v2100_v17  ;;  %v2109_v25 = vmul.f32 0.044715, %v2103_v22  ;;  %v2107_v41 = vmul.f32 0.5, %v2103_v22 }
 0xed7   : > { %v2114_v26 = vadd.f32 %v2112_v24, %v2100_v17  ;;  %v2111_v27 = vmul.f32 %v2109_v25, %v2103_v22 }
 0xed9   : > { %v2116_v28 = vmul.f32 0.7978846, %v2114_v26  ;;  %v2113_v31 = vmul.f32 %v2111_v27, %v2103_v22 }
 0xedb   : > { %3003 = vtanh.f32 %v2116_v28  ;;  %v2115_v30 = vadd.f32 %v2113_v31, %v2103_v22 }
 0xedd   : > { %v2117_v32 = vmul.f32 0.7978846, %v2115_v30 }
 0xedf   : > { %3005 = vtanh.f32 %v2117_v32 }
 0xee8   : > { %v3004_v37 = vpop.eup %3003 }
 0xee9   : > { %v2120_v38 = vadd.f32 1.0, %v3004_v37 }
 0xeeb   : > { %v2122_v42 = vmul.f32 %v2120_v38, %v2106_v46 }
 0xeec   : > { %v3006_v39 = vpop.eup %3005 }
 0xeed   : > { %v2121_v43 = vadd.f32 1.0, %v3006_v39 }
 0xeef   : > { %v2123_v45 = vmul.f32 %v2121_v43, %v2107_v41 }
 0xef1   : > { %v2124_v47 = vpack.c.bf16 %v2123_v45, %v2122_v42 }
 0xef3   : > { %2837 = vmatmul.mubr.msk.bf16.vlgmr.msra.gmra.mxu1 %vm2164_vm7, %v2124_v47 }
 0xfb3   : > { %v2202_v49 = vpop.f32.mrf.mxu1 }
 0xfb4   : > { %v2203_v50 = vadd.f32 %v2635_v48, %v2202_v49 }
 0xfb5   : > { %v2838_v51 = vpop.f32.mrf.mxu1 }
 0xfb6   : > { %v2209_v52 = vadd.f32 %v2203_v50, %v2036_v8 }
 0xfb7   : > { %v2205_v59 = vpop.f32.mrf.mxu1 }
 0xfb8   : > { %v2206_v53 = vadd.f32 %v2635_v48, %v2205_v59  ;;  %v2213_v63 = vsel %vm930_vm2, %v2209_v52, 0.0 }
 0xfb9   : > { %2214 = vadd.xlane.f32.xlu0 %v2213_v63  ;;  %v2839_v54 = vpop.f32.mrf.mxu1 }
 0xfba   : > { %v2210_v55 = vadd.f32 %v2206_v53, %v2037_v9 }
 0xfbc   : > { %v2216_v56 = vsel %vm930_vm2, %v2210_v55, 0.0 }
 0xfbd   : > { %2217 = vadd.xlane.f32.xlu1 %v2216_v56 }
0x1042   : > { %v2215_v33 = vpop.xlane.xlu0 %2214 }
0x1043   : > { %v2219_v57 = vmul.f32 0.03125, %v2215_v33 }
0x1045   : > { %v2221_v58 = vsub.f32 %v2209_v52, %v2219_v57 }
0x1046   : > { %v2218_v60 = vpop.xlane.xlu1 %2217 }
0x1047   : > { %v2220_v34 = vmul.f32 0.03125, %v2218_v60  ;;  %v2223_v40 = vmul.f32 %v2221_v58, %v2221_v58 }
0x1049   : > { %v2222_v29 = vsub.f32 %v2210_v55, %v2220_v34  ;;  %v2225_v35 = vsel %vm930_vm2, %v2223_v40, 0.0 }
0x104a   : > { %2226 = vadd.xlane.f32.xlu0 %v2225_v35 }
0x104b   : > { %v2224_v36 = vmul.f32 %v2222_v29, %v2222_v29 }
0x104d   : > { %v2228_v61 = vsel %vm930_vm2, %v2224_v36, 0.0 }
0x104e   : > { %2229 = vadd.xlane.f32.xlu1 %v2228_v61 }
0x10d3   : > { %v2227_v62 = vpop.xlane.xlu0 %2226 }
0x10d4   : > { %v2231_v0 = vmul.f32 0.03125, %v2227_v62 }
0x10d6   : > { %v2233_v1 = vadd.f32 1e-12, %v2231_v0 }
0x10d7   : > { %v2230_v2 = vpop.xlane.xlu1 %2229 }
0x10d8   : > { %3007 = vrsqrt.f32 %v2233_v1  ;;  %v2232_v3 = vmul.f32 0.03125, %v2230_v2 }
0x10da   : > { %v2234_v4 = vadd.f32 1e-12, %v2232_v3 }
0x10dc   : > { %3009 = vrsqrt.f32 %v2234_v4 }
0x10e5   : > { %v3008_v5 = vpop.eup %3007 }
0x10e6   : > { %v2237_v44 = vmul.f32 %v3008_v5, %v2221_v58 }
0x10e8   : > { %v2245_v8 = vmul.f32 %v2641_v6, %v2237_v44 }
0x10e9   : > { %v3010_v9 = vpop.eup %3009 }
0x10ea   : > { %v2253_v10 = vadd.f32 %v2642_v7, %v2245_v8  ;;  %v2238_v11 = vmul.f32 %v3010_v9, %v2222_v29 }
0x10ec   : > { %2255 = vst.msk [vmem:[#allocation2] sm:$0xff] %vm930_vm2, %v2253_v10  ;;  %v2246_v12 = vmul.f32 %v2641_v6, %v2238_v11  ;;  %2260 = sbr.rel (%p2643_p1) target bundleno = 4850 (0x12f2), region = 108 }
0x10ee   : > { %v2254_v13 = vadd.f32 %v2642_v7, %v2246_v12 }
0x10f0   : > { %2256 = vst.msk [vmem:[#allocation2 + $0x8] sm:$0xff] %vm930_vm2, %v2254_v13 }
0x10f1   : > { %v3011_v14 = vld [vmem:[%s3786_s17 + $0x8] sm:$0xff]   ;;  %v2261_v15 = vpack.c.bf16 %v2253_v10, %v2253_v10  ;;  %v2262_v16 = vpack.c.bf16 %v2254_v13, %v2254_v13  ;;  %v3126_v17 = vmov 0.0   ;;  %v3012_v18 = vld [vmem:[%s3786_s17] sm:$0xff]   ;;  %vm3127_vm8 = vmmov 0  }
0x10f2   : > { %2840 = vmatprep.subr.bf16.mxu0 %v3126_v17  ;;  %2844 = vmatprep.mubr.msk.bf16.mxu0 %vm3127_vm8, %v3126_v17  ;;  %vm2279_vm9 = vcmask 1041409   ;;  %v2644_v24 = vld [vmem:[%s3787_s24] ss:$0 sm:$0xff]  ;;  %vm2339_vm10 = vcmask 254976  }
0x10f3   : > { %2841 = vmatpush3.bf16.msra.mxu0 %v3011_v14  ;;  %v2276_v19 = vunpack.c.l.b16 %v2261_v15  ;;  %v2277_v20 = vunpack.c.l.b16 %v2262_v16  ;;  %v2648_v47 = vld [vmem:[%s3788_s27] ss:$0 sm:$0xff] }
0x10f4   : > { %2842 = vmatprep.subr.bf16.mxu0 %v3126_v17  ;;  %v2649_v49 = vld [vmem:[%s3789_s6] ss:$0 sm:$0xff] }
0x10f5   : > { %v2278_v21 = vrot.slane %v2277_v20, 7 }
0x10f7   : > { %2843 = vmatpush3.bf16.msra.mxu0 %v3012_v18  ;;  %v2280_v22 = vsel %vm2279_vm9, %v2278_v21, %v2276_v19 }
0x10f8   : > { %v2281_v23 = vpack.c.b16 %v2280_v22, %v2280_v22 }
0x10fa   : > { %2845 = vmatmul.mubr.msk.bf16.vlgmr.msra.gmra.mxu0 %vm930_vm2, %v2281_v23 }
0x11ba   : > { %v2331_v25 = vpop.f32.mrf.mxu0 }
0x11bb   : > { %v2332_v26 = vadd.f32 %v2644_v24, %v2331_v25 }
0x11bc   : > { %v2846_v27 = vpop.f32.mrf.mxu0 }
0x11bd   : > { %v2340_v28 = vsel %vm2339_vm10, %v2332_v26, 0.0 }
0x11be   : > { %2341 = vadd.xlane.f32.xlu0 %v2340_v28  ;;  %v2334_v31 = vpop.f32.mrf.mxu0 }
0x11c0   : > { %v2847_v30 = vpop.f32.mrf.mxu0 }
0x1247   : > { %v2342_v32 = vpop.xlane.xlu0 %2341 }
0x1248   : > { %v2343_v37 = vmul.f32 0.03125, %v2342_v32 }
0x124a   : > { %v2344_v38 = vsub.f32 %v2332_v26, %v2343_v37 }
0x124c   : > { %v2345_v39 = vmul.f32 %v2344_v38, %v2344_v38 }
0x124e   : > { %v2346_v46 = vsel %vm2339_vm10, %v2345_v39, 0.0 }
0x124f   : > { %2347 = vadd.xlane.f32.xlu0 %v2346_v46 }
0x12d8   : > { %v2348_v41 = vpop.xlane.xlu0 %2347 }
0x12d9   : > { %v2349_v43 = vmul.f32 0.03125, %v2348_v41 }
0x12db   : > { %v2350_v42 = vadd.f32 1e-12, %v2349_v43 }
0x12dd   : > { %3013 = vrsqrt.f32 %v2350_v42 }
0x12ea   : > { %v3014_v45 = vpop.eup %3013 }
0x12eb   : > { %v2352_v48 = vmul.f32 %v3014_v45, %v2344_v38 }
0x12ed   : > { %v2359_v50 = vmul.f32 %v2648_v47, %v2352_v48 }
0x12ef   : > { %v2366_v51 = vadd.f32 %v2649_v49, %v2359_v50 }
0x12f1   : > { %2367 = vst.msk [vmem:[%s795_s15] sm:$0x3] %vm2339_vm10, %v2366_v51 }
0x12f2 PF: > { %s3790_s20 = sld [smem:[#allocation10_spill]]  ;;  %s2382_s22 = sshll.u32 %s795_s15, 4  ;;  %s2383_s22 = int_to_ptr.vmem [resolvable:$true] %s2382_s22 }
0x12f3   : > { %s3791_s19 = sld [smem:[#allocation7_spill]]  ;;  %s3015_s3 = scalar_lea.vmem %s2383_s22, 32 }
0x12f4   : > { %s3793_s30 = sld [smem:[#allocation32_spill]]  ;;  %p3016_p2 = scmp.ne.s32.totalorder %s2383_s22, %s3015_s3 }
0x12f5   : > { %s3128_s18 = smov [#allocation3]  }
0x12f6   : > { %p3017_p4 = pnand %p3016_p2, %p3283_p3  ;;  %s3019_s24 = sshll.u32 %s3128_s18, 4  ;;  %s3020_s24 = int_to_ptr.vmem [resolvable:$false] %s3019_s24 }
0x12f7   : > { %s3021_s28 = scalar_lea.vmem %s3020_s24, 64  ;;  %p3022_p6 = scmp.lt.s32.totalorder %s2383_s22, %s3020_s24 }
0x12f8   : > { %s2651_s26 = sshll.u32 %s3790_s20, 5  ;;  %p3018_p5 = pneg %p3017_p4 }
0x12f9   : > { %s3794_s10 = sand.u32 1, %s3791_s19   ;;  %p3023_p7 = scmp.lt.s32.totalorder %s3021_s28, %s3015_s3 }
0x12fa   : > { %s2380_s16 = scalar_lea.hbm %s3793_s30, %s2651_s26  ;;  %s2369_s1 = scalar_lea.sflag [#allocation4], %s3794_s10 }
0x12fb   : > { %p3024_p8 = por %p3023_p7, %p3022_p6 }
0x12fd   : > { %p3025_p10 = pnand %p3024_p8, %p3018_p5 }
0x12ff   : > { %3028 = shalt.err (!%p3025_p10)
}
0x1300   : > { %s3029_s4 = scalar_lea.hbm %s2380_s16, 32  ;;  %s3033_s27 = scalar_lea.hbm %s3793_s30, 64 }
0x1301   : > { %p3030_p11 = scmp.ne.s32.totalorder %s2380_s16, %s3029_s4  ;;  %p3034_p0 = scmp.lt.s32.totalorder %s2380_s16, %s3793_s30 }
0x1302   : > { %p3035_p1 = scmp.lt.s32.totalorder %s3033_s27, %s3029_s4 }
0x1303   : > { %p3031_p12 = pnand %p3030_p11, %p3283_p3 }
0x1304   : > { %p3036_p2 = por %p3035_p1, %p3034_p0 }
0x1305   : > { %p3032_p13 = pneg %p3031_p12 }
0x1307   : > { %p3037_p4 = pnand %p3036_p2, %p3032_p13 }
0x1309   : > { %3040 = shalt.err (!%p3037_p4)
}
0x130a   : > { %2848 = dma.vmem_to_hbm [thread:$0]  (%p3283_p3), %s2383_s22, 32, %s2380_s16, %s2369_s1  }
0x130b PF: > { %s3795_s6 = sld [smem:[#allocation13_spill]] }
0x130c   : > { %s3796_s20 = sld [smem:[#allocation6_spill]] }
0x1311   : > { %p2854_p5 = scmp.ge.s32.totalorder %s3795_s6, 2 }
0x1312   : > { %s2394_s26 = sand.u32 1, %s3796_s20  }
0x1313   : > { %p2851_p6 = pnand %p2854_p5, %p3293_p9  ;;  %s2395_s21 = scalar_lea.sflag [#allocation4], %s2394_s26 }
0x1315   : > { %p2852_p7 = pneg %p2851_p6 }
0x1317   : > { %3074 = dma.done.wait (%p2852_p7), %s2395_s21, 32  }
0x1318   : > { %3076 = vsyncadd (%p2852_p7), %s2395_s21, 4294967264  ;;  %s33_s26 = sadd.s32 1, %s3795_s6   ;;  %s3798_s1 = sld [smem:[#allocation7_spill]] }
0x1319   : > { %p30_p8 = scmp.ge.s32.totalorder %s33_s26, 6   ;;  %s3799_s22 = sld [smem:[#allocation8_spill]] }
0x131a   : > { %s3800_s23 = sld [smem:[#allocation18_spill]] }
0x131b   : > { %s3801_s24 = sld [smem:[#allocation11_spill]]  ;;  %32 = sbr.rel (!%p30_p8) target bundleno = 19 (0x13), region = 182 }
0x131c   : > { %s3802_s2 = sld [smem:[#allocation12_spill]] }
0x131d   : > { %s3803_s25 = sld [smem:[#allocation14_spill]] }
0x131e   : > { %s3804_s3 = sld [smem:[#allocation16_spill]] }
0x1320   :  { %2400 = vsyncpa [#allocation4], 1 }
0x1321   :  { %2402 = vsyncpa [#allocation4 + $0x1], 1 }

</bundles_post_ra>
